<compile_context>
chip_gen: v5e
topology: v5e:2x2
jax: 0.10.0
libtpu: 0.0.40
codegen_flags: <defaults>
</compile_context>

<pallas_src>
import functools

import jax
import jax.numpy as jnp
from jax.experimental import pallas as pl
from jax.experimental.pallas import tpu as pltpu

BITS = (2, 3, 4, 5, 6, 7, 8)
N_BITS = len(BITS)
HIDDEN = 32            # 4*HIDDEN == 128 == lane width keeps the gate vector lane-dense
N_LAYERS = 3
LANES = 4 * HIDDEN     # 128
NEG_INF = -1e30        # finite "-inf": exp underflows to exactly 0, 0*log never NaNs

# ---- packed parameter-slab row layout (one lane-dense (SLAB_ROWS, 128) f32 input) ----
_EMB_ROWS = 8                            # emb@W_ih^T in rows [0,8); rows >= N_BITS are zero
_ROW_EMB = 0
_ROW_WHH = _ROW_EMB + _EMB_ROWS          # 8  .. 8+H   W_hh^T (gate-scaled)
_ROW_BIAS = _ROW_WHH + HIDDEN            # 40          b_ih + b_hh (gate-scaled)
_ROW_BW = _ROW_BIAS + 1                  # 41          weight-head bias, padding lanes NEG_INF
_ROW_BA = _ROW_BIAS + 2                  # 42          activation-head bias, same padding
_ROW_WW = ((_ROW_BA + 1 + 7) // 8) * 8   # 48 .. 48+H  weight-head W^T, lane-padded zeros
_ROW_WA = _ROW_WW + HIDDEN               # 80 .. 80+H  activation-head W^T
SLAB_ROWS = _ROW_WA + HIDDEN             # 112


def _controller_kernel(slab_ref, gumb_ref, out_ref, *, n_steps):
    H = HIDDEN

    # Hoist every parameter load out of the unrolled loop (Mosaic does not CSE ref reads).
    emb_wih = slab_ref[_ROW_EMB:_ROW_EMB + _EMB_ROWS, :]   # (8, 4H) folded emb@W_ih^T (scaled)
    whh = slab_ref[_ROW_WHH:_ROW_WHH + H, :]               # (H, 4H) W_hh^T (scaled)
    bias = slab_ref[_ROW_BIAS:_ROW_BIAS + 1, :]            # (1, 4H) lstm bias (scaled)
    bw_row = slab_ref[_ROW_BW:_ROW_BW + 1, :]              # (1, 4H) lanes>=N_BITS == NEG_INF
    ba_row = slab_ref[_ROW_BA:_ROW_BA + 1, :]              # (1, 4H)
    ww = slab_ref[_ROW_WW:_ROW_WW + H, :]                  # (H, 4H) lanes>=N_BITS are zero
    wa = slab_ref[_ROW_WA:_ROW_WA + H, :]                  # (H, 4H)

    lane_i = jax.lax.broadcasted_iota(jnp.int32, (1, LANES), 1)
    lane_f = lane_i.astype(jnp.float32)
    erow_i = jax.lax.broadcasted_iota(jnp.int32, (_EMB_ROWS, 1), 0)
    out_rows = out_ref.shape[0]
    orow = jax.lax.broadcasted_iota(jnp.int32, (out_rows, LANES), 0)
    olane = jax.lax.broadcasted_iota(jnp.int32, (out_rows, LANES), 1)

    hx = jnp.zeros((1, H), jnp.float32)
    cx = jnp.zeros((1, H), jnp.float32)
    emb_contrib = jnp.zeros((1, LANES), jnp.float32)
    logp_sum = jnp.zeros((1, 1), jnp.float32)
    ent_sum = jnp.zeros((1, 1), jnp.float32)
    out_acc = jnp.zeros((out_rows, LANES), jnp.float32)

    for step in range(n_steps):        # static unroll — n_steps = 2 * n_layers is small
        # ---- LSTMCell (PyTorch gate order i, f, g, o).  i/f/o gate columns were
        # pre-scaled by 0.5 at pack time so ONE tanh yields both sigmoid and tanh. ----
        if step == 0:
            gates = bias               # hx == 0 and embed == 0 at step 0: skip both matmuls
        else:
            gates = (emb_contrib
                     + jnp.dot(hx, whh, preferred_element_type=jnp.float32)
                     + bias)
        t = jnp.tanh(gates)                           # single EUP pass over all 4H lanes
        i_g = 0.5 * t[:, 0:H] + 0.5                   # sigmoid(x) = 0.5 * tanh(x/2) + 0.5
        f_g = 0.5 * t[:, H:2 * H] + 0.5
        g_g = t[:, 2 * H:3 * H]
        o_g = 0.5 * t[:, 3 * H:4 * H] + 0.5
        cx = f_g * cx + i_g * g_g
        hx = o_g * jnp.tanh(cx)

        # ---- head: weight bits on even steps, activation bits on odd steps.  Padding
        # lanes get NEG_INF bias so the 128-lane softmax equals the 7-way softmax. ----
        if step % 2 == 0:
            logits = jnp.dot(hx, ww, preferred_element_type=jnp.float32) + bw_row
        else:
            logits = jnp.dot(hx, wa, preferred_element_type=jnp.float32) + ba_row

        # ---- softmax / log-softmax (lane-dense; approx reciprocal stays on the EUP) ----
        m = jnp.max(logits, axis=-1, keepdims=True)
        e = jnp.exp(logits - m)
        denom = jnp.sum(e, axis=-1, keepdims=True)
        probs = e * pl.reciprocal(denom, approx=True)
        log_probs = (logits - m) - jnp.log(denom)     # exact log keeps logp exact

        # ---- categorical sample = Gumbel-max with host-precomputed noise: only lane
        # max/min reductions (XLU), no MXU push, no cross-lane prefix sum. ----
        z = logits + gumb_ref[step:step + 1, :]
        zmax = jnp.max(z, axis=-1, keepdims=True)
        act_f = jnp.min(jnp.where(z >= zmax, lane_f, jnp.float32(LANES)),
                        axis=-1, keepdims=True)       # (1, 1) sampled index, as f32
        act_i = act_f.astype(jnp.int32)
        onehot = (lane_i == act_i).astype(jnp.float32)

        logp_sum = logp_sum + jnp.sum(onehot * log_probs, axis=-1, keepdims=True)
        ent_sum = ent_sum - jnp.sum(probs * log_probs, axis=-1, keepdims=True)

        # ---- next-step embedding contribution: sublane mask-select of the folded
        # emb@W_ih^T rows (VPU + XLU), keeping the MXU at one push for the recurrence. ----
        emb_contrib = jnp.sum(jnp.where(erow_i == act_i, emb_wih, 0.0),
                              axis=0, keepdims=True)   # (1, 4H)

        # ---- accumulate outputs in registers; one unmasked store after the loop. ----
        out_acc = jnp.where(orow == step,
                            jnp.broadcast_to(probs, (out_rows, LANES)), out_acc)
        out_acc = jnp.where((orow == n_steps + 1) & (olane == step),
                            jnp.broadcast_to(act_f, (out_rows, LANES)), out_acc)

    out_acc = jnp.where((orow == n_steps) & (olane == 0),
                        jnp.broadcast_to(logp_sum, (out_rows, LANES)), out_acc)
    out_acc = jnp.where((orow == n_steps) & (olane == 1),
                        jnp.broadcast_to(ent_sum, (out_rows, LANES)), out_acc)
    out_ref[...] = out_acc


@functools.partial(jax.jit, static_argnames=("n_layers",))
def controller_forward(param_slab, gumbel, n_layers=N_LAYERS):
    """One NAS rollout. gumbel: (2*n_layers, N_BITS) host-precomputed Gumbel(0,1) noise."""
    n_steps = 2 * n_layers
    gum_rows = ((n_steps + 7) // 8) * 8
    out_rows = ((n_steps + 2 + 7) // 8) * 8
    gum_block = jnp.zeros((gum_rows, LANES), jnp.float32).at[:n_steps, :N_BITS].set(gumbel)

    vmem = pl.BlockSpec(memory_space=pltpu.MemorySpace.VMEM)
    out = pl.pallas_call(
        functools.partial(_controller_kernel, n_steps=n_steps),
        out_shape=jax.ShapeDtypeStruct((out_rows, LANES), jnp.float32),
        in_specs=[vmem, vmem],
        out_specs=vmem,
    )(param_slab, gum_block)

    probs = out[:n_steps, :N_BITS]                       # per-step softmax probabilities
    logp = out[n_steps, 0]                               # sum of selected log-probs
    ent = out[n_steps, 1]                                # sum of per-step entropies
    actions = out[n_steps + 1, :n_steps].astype(jnp.int32)
    return actions, probs, logp, ent


def init_raw_params(key, hidden=HIDDEN, n_bits=N_BITS, init_range=0.1):
    """Mirrors Controller.__init__ + reset_parameters (uniform(-0.1, 0.1)), torch layout."""
    ks = jax.random.split(key, 9)
    u = lambda k, shape: jax.random.uniform(k, shape, jnp.float32, -init_range, init_range)
    return {
        "emb":  u(ks[0], (n_bits, hidden)),       # bit_embedding.weight
        "w_ih": u(ks[1], (4 * hidden, hidden)),   # LSTMCell weight_ih (i,f,g,o stacked)
        "w_hh": u(ks[2], (4 * hidden, hidden)),
        "b_ih": u(ks[3], (4 * hidden,)),
        "b_hh": u(ks[4], (4 * hidden,)),
        "w_w":  u(ks[5], (n_bits, hidden)),       # weight_bits_linear.weight
        "b_w":  u(ks[6], (n_bits,)),
        "w_a":  u(ks[7], (n_bits, hidden)),       # activation_bits_linear.weight
        "b_a":  u(ks[8], (n_bits,)),
    }


def pack_params(raw):
    """Pack all Controller parameters into one lane-dense (SLAB_ROWS, 128) f32 slab."""
    H, nb = HIDDEN, N_BITS
    assert raw["w_hh"].shape == (4 * H, H) and nb <= _EMB_ROWS and 4 * H == LANES

    gate_scale = jnp.concatenate([
        jnp.full((2 * H,), 0.5, jnp.float32),     # i, f  (sigmoid via 0.5*tanh(x/2)+0.5)
        jnp.ones((H,), jnp.float32),              # g     (true tanh)
        jnp.full((H,), 0.5, jnp.float32),         # o
    ])

    emb_wih = (raw["emb"] @ raw["w_ih"].T) * gate_scale[None, :]     # (nb, 4H)
    whh_t = raw["w_hh"].T * gate_scale[None, :]                      # (H, 4H)
    bias = (raw["b_ih"] + raw["b_hh"]) * gate_scale                  # (4H,)

    slab = jnp.zeros((SLAB_ROWS, LANES), jnp.float32)
    slab = slab.at[_ROW_EMB:_ROW_EMB + nb, :].set(emb_wih)
    slab = slab.at[_ROW_WHH:_ROW_WHH + H, :].set(whh_t)
    slab = slab.at[_ROW_BIAS, :].set(bias)
    slab = slab.at[_ROW_BW, :].set(
        jnp.full((LANES,), NEG_INF, jnp.float32).at[:nb].set(raw["b_w"]))
    slab = slab.at[_ROW_BA, :].set(
        jnp.full((LANES,), NEG_INF, jnp.float32).at[:nb].set(raw["b_a"]))
    slab = slab.at[_ROW_WW:_ROW_WW + H, :nb].set(raw["w_w"].T)
    slab = slab.at[_ROW_WA:_ROW_WA + H, :nb].set(raw["w_a"].T)
    return slab


def reference_teacher_forced(raw, actions_seq, n_layers):
    """Pure-JAX reference roll-out (torch math, unscaled params) following given actions."""
    H = raw["w_hh"].shape[1]
    hx = jnp.zeros((1, H), jnp.float32)
    cx = jnp.zeros((1, H), jnp.float32)
    embed = jnp.zeros((1, H), jnp.float32)
    probs_all, logits_all = [], []
    logp = jnp.float32(0.0)
    ent = jnp.float32(0.0)
    for step in range(2 * n_layers):
        gates = (embed @ raw["w_ih"].T + hx @ raw["w_hh"].T
                 + (raw["b_ih"] + raw["b_hh"])[None, :])
        i = jax.nn.sigmoid(gates[:, 0:H])
        f = jax.nn.sigmoid(gates[:, H:2 * H])
        g = jnp.tanh(gates[:, 2 * H:3 * H])
        o = jax.nn.sigmoid(gates[:, 3 * H:4 * H])
        cx = f * cx + i * g
        hx = o * jnp.tanh(cx)
        if step % 2 == 0:
            logits = hx @ raw["w_w"].T + raw["b_w"][None, :]
        else:
            logits = hx @ raw["w_a"].T + raw["b_a"][None, :]
        p = jax.nn.softmax(logits, axis=-1)
        lp = jax.nn.log_softmax(logits, axis=-1)
        a = int(actions_seq[step])
        probs_all.append(p[0])
        logits_all.append(logits[0])
        logp = logp + lp[0, a]
        ent = ent - jnp.sum(p * lp)
        embed = raw["emb"][a][None, :]
    return jnp.stack(probs_all), jnp.stack(logits_all), logp, ent


if __name__ == "__main__":
    key = jax.random.PRNGKey(0)
    kp, kg = jax.random.split(key)
    raw = init_raw_params(kp)
    param_slab = pack_params(raw)
    n_steps = 2 * N_LAYERS
    gumbel = jax.random.gumbel(kg, (n_steps, N_BITS), jnp.float32)

    actions, probs, logp, ent = controller_forward(param_slab, gumbel, n_layers=N_LAYERS)
    jax.block_until_ready((actions, probs, logp, ent))

    # Post-process to mirror the PyTorch forward() return structure.
    action_ids = [int(a) for a in actions]
    bits_seq = [BITS[a] for a in action_ids]
    probs_buf = [probs[i] for i in range(n_steps)]
    sum_log_p = float(logp)
    sum_entropy = float(ent)

    # --- sanity checks ---
    assert len(bits_seq) == n_steps and len(probs_buf) == n_steps
    assert all(0 <= a < N_BITS for a in action_ids)
    assert bool(jnp.all(jnp.abs(jnp.sum(probs, axis=-1) - 1.0) < 5e-3))  # approx-recip slack
    assert bool(jnp.isfinite(probs).all()) and jnp.isfinite(logp) and jnp.isfinite(ent)

    # Teacher-forced pure-JAX reference (same sampled actions) must match probs/logp/entropy.
    ref_probs, ref_logits, ref_logp, ref_ent = reference_teacher_forced(raw, action_ids, N_LAYERS)
    assert bool(jnp.all(jnp.abs(probs - ref_probs) < 5e-3))
    assert abs(sum_log_p - float(ref_logp)) < 2e-2
    assert abs(sum_entropy - float(ref_ent)) < 2e-2

    # Gumbel-max consistency: each sampled action must (near-)maximize ref_logits + gumbel.
    z_ref = ref_logits + gumbel
    for s in range(n_steps):
        assert float(z_ref[s, action_ids[s]]) >= float(jnp.max(z_ref[s])) - 1e-3

    print("KERNEL_OK")
</pallas_src>

<mosaic_0001>
module attributes {stable_mosaic.version = 11 : i64} {
  func.func @_controller_kernel(%arg0: memref<112x128xf32, #tpu.memory_space<vmem>>, %arg1: memref<8x128xf32, #tpu.memory_space<vmem>>, %arg2: memref<8x128xf32, #tpu.memory_space<vmem>>) attributes {dimension_semantics = [], scalar_prefetch = 0 : i64, scratch_operands = 0 : i64, tpu.core_type = #tpu.core_type<tc>} {
    %c0 = arith.constant 0 : index
    %c0_0 = arith.constant 0 : index
    %0 = vector.load %arg0[%c0, %c0_0] : memref<112x128xf32, #tpu.memory_space<vmem>>, vector<8x128xf32>
    %c8 = arith.constant 8 : index
    %c0_1 = arith.constant 0 : index
    %1 = vector.load %arg0[%c8, %c0_1] : memref<112x128xf32, #tpu.memory_space<vmem>>, vector<32x128xf32>
    %c40 = arith.constant 40 : index
    %c0_2 = arith.constant 0 : index
    %2 = vector.load %arg0[%c40, %c0_2] : memref<112x128xf32, #tpu.memory_space<vmem>>, vector<1x128xf32>
    %c41 = arith.constant 41 : index
    %c0_3 = arith.constant 0 : index
    %3 = vector.load %arg0[%c41, %c0_3] : memref<112x128xf32, #tpu.memory_space<vmem>>, vector<1x128xf32>
    %c42 = arith.constant 42 : index
    %c0_4 = arith.constant 0 : index
    %4 = vector.load %arg0[%c42, %c0_4] : memref<112x128xf32, #tpu.memory_space<vmem>>, vector<1x128xf32>
    %c48 = arith.constant 48 : index
    %c0_5 = arith.constant 0 : index
    %5 = vector.load %arg0[%c48, %c0_5] : memref<112x128xf32, #tpu.memory_space<vmem>>, vector<32x128xf32>
    %c80 = arith.constant 80 : index
    %c0_6 = arith.constant 0 : index
    %6 = vector.load %arg0[%c80, %c0_6] : memref<112x128xf32, #tpu.memory_space<vmem>>, vector<32x128xf32>
    %7 = tpu.iota {dimensions = array<i32: 1>} : vector<1x128xi32>
    %8 = arith.sitofp %7 : vector<1x128xi32> to vector<1x128xf32>
    %9 = tpu.iota {dimensions = array<i32: 0>} : vector<8x1xi32>
    %10 = tpu.iota {dimensions = array<i32: 0>} : vector<8x128xi32>
    %11 = tpu.iota {dimensions = array<i32: 1>} : vector<8x128xi32>
    %cst = arith.constant 0.000000e+00 : f32
    %12 = vector.broadcast %cst : f32 to vector<1x32xf32>
    %cst_7 = arith.constant 0.000000e+00 : f32
    %13 = vector.broadcast %cst_7 : f32 to vector<1x1xf32>
    %cst_8 = arith.constant 0.000000e+00 : f32
    %14 = vector.broadcast %cst_8 : f32 to vector<1x1xf32>
    %cst_9 = arith.constant 0.000000e+00 : f32
    %15 = vector.broadcast %cst_9 : f32 to vector<8x128xf32>
    %16 = math.tanh %2 : vector<1x128xf32>
    %17 = vector.extract_strided_slice %16 {offsets = [0, 0], sizes = [1, 32], strides = [1, 1]} : vector<1x128xf32> to vector<1x32xf32>
    %cst_10 = arith.constant 5.000000e-01 : f32
    %18 = vector.broadcast %cst_10 : f32 to vector<1x32xf32>
    %19 = arith.mulf %18, %17 : vector<1x32xf32>
    %cst_11 = arith.constant 5.000000e-01 : f32
    %20 = vector.broadcast %cst_11 : f32 to vector<1x32xf32>
    %21 = arith.addf %19, %20 : vector<1x32xf32>
    %22 = vector.extract_strided_slice %16 {offsets = [0, 32], sizes = [1, 32], strides = [1, 1]} : vector<1x128xf32> to vector<1x32xf32>
    %cst_12 = arith.constant 5.000000e-01 : f32
    %23 = vector.broadcast %cst_12 : f32 to vector<1x32xf32>
    %24 = arith.mulf %23, %22 : vector<1x32xf32>
    %cst_13 = arith.constant 5.000000e-01 : f32
    %25 = vector.broadcast %cst_13 : f32 to vector<1x32xf32>
    %26 = arith.addf %24, %25 : vector<1x32xf32>
    %27 = vector.extract_strided_slice %16 {offsets = [0, 64], sizes = [1, 32], strides = [1, 1]} : vector<1x128xf32> to vector<1x32xf32>
    %28 = vector.extract_strided_slice %16 {offsets = [0, 96], sizes = [1, 32], strides = [1, 1]} : vector<1x128xf32> to vector<1x32xf32>
    %cst_14 = arith.constant 5.000000e-01 : f32
    %29 = vector.broadcast %cst_14 : f32 to vector<1x32xf32>
    %30 = arith.mulf %29, %28 : vector<1x32xf32>
    %cst_15 = arith.constant 5.000000e-01 : f32
    %31 = vector.broadcast %cst_15 : f32 to vector<1x32xf32>
    %32 = arith.addf %30, %31 : vector<1x32xf32>
    %33 = arith.mulf %26, %12 : vector<1x32xf32>
    %34 = arith.mulf %21, %27 : vector<1x32xf32>
    %35 = arith.addf %33, %34 : vector<1x32xf32>
    %36 = math.tanh %35 : vector<1x32xf32>
    %37 = arith.mulf %32, %36 : vector<1x32xf32>
    %cst_16 = arith.constant dense<0.000000e+00> : vector<1x128xf32>
    %38 = tpu.matmul %37, %5, %cst_16 {dimension_numbers = #tpu.dot_dimension_numbers<[1], [0], [0], [1], [0, 0, 1, 1], [], []>} : vector<1x32xf32>, vector<32x128xf32>, vector<1x128xf32> -> vector<1x128xf32>
    %39 = arith.addf %38, %3 : vector<1x128xf32>
    %cst_17 = arith.constant dense<0xFF800000> : vector<1xf32>
    %40 = vector.multi_reduction <maximumf>, %39, %cst_17 [1] : vector<1x128xf32> to vector<1xf32>
    %41 = vector.shape_cast %40 : vector<1xf32> to vector<1x1xf32>
    %42 = vector.broadcast %41 : vector<1x1xf32> to vector<1x128xf32>
    %43 = arith.subf %39, %42 : vector<1x128xf32>
    %44 = math.exp %43 : vector<1x128xf32>
    %cst_18 = arith.constant dense<0.000000e+00> : vector<1xf32>
    %45 = vector.multi_reduction <add>, %44, %cst_18 [1] : vector<1x128xf32> to vector<1xf32>
    %46 = vector.shape_cast %45 : vector<1xf32> to vector<1x1xf32>
    %47 = tpu.reciprocal %46 {approx = true} : vector<1x1xf32> -> vector<1x1xf32>
    %48 = vector.broadcast %47 : vector<1x1xf32> to vector<1x128xf32>
    %49 = arith.mulf %44, %48 : vector<1x128xf32>
    %50 = vector.broadcast %41 : vector<1x1xf32> to vector<1x128xf32>
    %51 = arith.subf %39, %50 : vector<1x128xf32>
    %52 = math.log %46 : vector<1x1xf32>
    %53 = vector.broadcast %52 : vector<1x1xf32> to vector<1x128xf32>
    %54 = arith.subf %51, %53 : vector<1x128xf32>
    %c0_19 = arith.constant 0 : index
    %c0_20 = arith.constant 0 : index
    %55 = vector.load %arg1[%c0_19, %c0_20] : memref<8x128xf32, #tpu.memory_space<vmem>>, vector<1x128xf32>
    %56 = arith.addf %39, %55 : vector<1x128xf32>
    %cst_21 = arith.constant dense<0xFF800000> : vector<1xf32>
    %57 = vector.multi_reduction <maximumf>, %56, %cst_21 [1] : vector<1x128xf32> to vector<1xf32>
    %58 = vector.shape_cast %57 : vector<1xf32> to vector<1x1xf32>
    %59 = vector.broadcast %58 : vector<1x1xf32> to vector<1x128xf32>
    %60 = arith.cmpf oge, %56, %59 : vector<1x128xf32>
    %cst_22 = arith.constant 1.280000e+02 : f32
    %61 = vector.broadcast %cst_22 : f32 to vector<1x128xf32>
    %62 = arith.select %60, %8, %61 : vector<1x128xi1>, vector<1x128xf32>
    %cst_23 = arith.constant dense<0x7F800000> : vector<1xf32>
    %63 = vector.multi_reduction <minimumf>, %62, %cst_23 [1] : vector<1x128xf32> to vector<1xf32>
    %64 = vector.shape_cast %63 : vector<1xf32> to vector<1x1xf32>
    %65 = arith.fptosi %64 : vector<1x1xf32> to vector<1x1xi32>
    %66 = vector.broadcast %65 : vector<1x1xi32> to vector<1x128xi32>
    %67 = arith.cmpi eq, %7, %66 : vector<1x128xi32>
    %68 = arith.extui %67 : vector<1x128xi1> to vector<1x128xi32>
    %69 = arith.sitofp %68 : vector<1x128xi32> to vector<1x128xf32>
    %70 = arith.mulf %69, %54 : vector<1x128xf32>
    %cst_24 = arith.constant dense<0.000000e+00> : vector<1xf32>
    %71 = vector.multi_reduction <add>, %70, %cst_24 [1] : vector<1x128xf32> to vector<1xf32>
    %72 = vector.shape_cast %71 : vector<1xf32> to vector<1x1xf32>
    %73 = arith.addf %13, %72 : vector<1x1xf32>
    %74 = arith.mulf %49, %54 : vector<1x128xf32>
    %cst_25 = arith.constant dense<0.000000e+00> : vector<1xf32>
    %75 = vector.multi_reduction <add>, %74, %cst_25 [1] : vector<1x128xf32> to vector<1xf32>
    %76 = vector.shape_cast %75 : vector<1xf32> to vector<1x1xf32>
    %77 = arith.subf %14, %76 : vector<1x1xf32>
    %78 = vector.broadcast %65 : vector<1x1xi32> to vector<8x1xi32>
    %79 = arith.cmpi eq, %9, %78 : vector<8x1xi32>
    %cst_26 = arith.constant 0.000000e+00 : f32
    %80 = vector.shape_cast %79 : vector<8x1xi1> to vector<8x1xi1>
    %81 = vector.broadcast %80 : vector<8x1xi1> to vector<8x128xi1>
    %82 = vector.broadcast %cst_26 : f32 to vector<8x128xf32>
    %83 = arith.select %81, %0, %82 : vector<8x128xi1>, vector<8x128xf32>
    %cst_27 = arith.constant dense<0.000000e+00> : vector<128xf32>
    %84 = vector.multi_reduction <add>, %83, %cst_27 [0] : vector<8x128xf32> to vector<128xf32>
    %85 = vector.shape_cast %84 : vector<128xf32> to vector<1x128xf32>
    %c0_i32 = arith.constant 0 : i32
    %86 = vector.broadcast %c0_i32 : i32 to vector<8x128xi32>
    %87 = arith.cmpi eq, %10, %86 : vector<8x128xi32>
    %88 = vector.shape_cast %49 : vector<1x128xf32> to vector<1x128xf32>
    %89 = vector.broadcast %88 : vector<1x128xf32> to vector<8x128xf32>
    %90 = arith.select %87, %89, %15 : vector<8x128xi1>, vector<8x128xf32>
    %c7_i32 = arith.constant 7 : i32
    %91 = vector.broadcast %c7_i32 : i32 to vector<8x128xi32>
    %92 = arith.cmpi eq, %10, %91 : vector<8x128xi32>
    %c0_i32_28 = arith.constant 0 : i32
    %93 = vector.broadcast %c0_i32_28 : i32 to vector<8x128xi32>
    %94 = arith.cmpi eq, %11, %93 : vector<8x128xi32>
    %95 = arith.andi %92, %94 : vector<8x128xi1>
    %96 = vector.shape_cast %64 : vector<1x1xf32> to vector<1x1xf32>
    %97 = vector.broadcast %96 : vector<1x1xf32> to vector<8x128xf32>
    %98 = arith.select %95, %97, %90 : vector<8x128xi1>, vector<8x128xf32>
    %cst_29 = arith.constant dense<0.000000e+00> : vector<1x128xf32>
    %99 = tpu.matmul %37, %1, %cst_29 {dimension_numbers = #tpu.dot_dimension_numbers<[1], [0], [0], [1], [0, 0, 1, 1], [], []>} : vector<1x32xf32>, vector<32x128xf32>, vector<1x128xf32> -> vector<1x128xf32>
    %100 = arith.addf %85, %99 : vector<1x128xf32>
    %101 = arith.addf %100, %2 : vector<1x128xf32>
    %102 = math.tanh %101 : vector<1x128xf32>
    %103 = vector.extract_strided_slice %102 {offsets = [0, 0], sizes = [1, 32], strides = [1, 1]} : vector<1x128xf32> to vector<1x32xf32>
    %cst_30 = arith.constant 5.000000e-01 : f32
    %104 = vector.broadcast %cst_30 : f32 to vector<1x32xf32>
    %105 = arith.mulf %104, %103 : vector<1x32xf32>
    %cst_31 = arith.constant 5.000000e-01 : f32
    %106 = vector.broadcast %cst_31 : f32 to vector<1x32xf32>
    %107 = arith.addf %105, %106 : vector<1x32xf32>
    %108 = vector.extract_strided_slice %102 {offsets = [0, 32], sizes = [1, 32], strides = [1, 1]} : vector<1x128xf32> to vector<1x32xf32>
    %cst_32 = arith.constant 5.000000e-01 : f32
    %109 = vector.broadcast %cst_32 : f32 to vector<1x32xf32>
    %110 = arith.mulf %109, %108 : vector<1x32xf32>
    %cst_33 = arith.constant 5.000000e-01 : f32
    %111 = vector.broadcast %cst_33 : f32 to vector<1x32xf32>
    %112 = arith.addf %110, %111 : vector<1x32xf32>
    %113 = vector.extract_strided_slice %102 {offsets = [0, 64], sizes = [1, 32], strides = [1, 1]} : vector<1x128xf32> to vector<1x32xf32>
    %114 = vector.extract_strided_slice %102 {offsets = [0, 96], sizes = [1, 32], strides = [1, 1]} : vector<1x128xf32> to vector<1x32xf32>
    %cst_34 = arith.constant 5.000000e-01 : f32
    %115 = vector.broadcast %cst_34 : f32 to vector<1x32xf32>
    %116 = arith.mulf %115, %114 : vector<1x32xf32>
    %cst_35 = arith.constant 5.000000e-01 : f32
    %117 = vector.broadcast %cst_35 : f32 to vector<1x32xf32>
    %118 = arith.addf %116, %117 : vector<1x32xf32>
    %119 = arith.mulf %112, %35 : vector<1x32xf32>
    %120 = arith.mulf %107, %113 : vector<1x32xf32>
    %121 = arith.addf %119, %120 : vector<1x32xf32>
    %122 = math.tanh %121 : vector<1x32xf32>
    %123 = arith.mulf %118, %122 : vector<1x32xf32>
    %cst_36 = arith.constant dense<0.000000e+00> : vector<1x128xf32>
    %124 = tpu.matmul %123, %6, %cst_36 {dimension_numbers = #tpu.dot_dimension_numbers<[1], [0], [0], [1], [0, 0, 1, 1], [], []>} : vector<1x32xf32>, vector<32x128xf32>, vector<1x128xf32> -> vector<1x128xf32>
    %125 = arith.addf %124, %4 : vector<1x128xf32>
    %cst_37 = arith.constant dense<0xFF800000> : vector<1xf32>
    %126 = vector.multi_reduction <maximumf>, %125, %cst_37 [1] : vector<1x128xf32> to vector<1xf32>
    %127 = vector.shape_cast %126 : vector<1xf32> to vector<1x1xf32>
    %128 = vector.broadcast %127 : vector<1x1xf32> to vector<1x128xf32>
    %129 = arith.subf %125, %128 : vector<1x128xf32>
    %130 = math.exp %129 : vector<1x128xf32>
    %cst_38 = arith.constant dense<0.000000e+00> : vector<1xf32>
    %131 = vector.multi_reduction <add>, %130, %cst_38 [1] : vector<1x128xf32> to vector<1xf32>
    %132 = vector.shape_cast %131 : vector<1xf32> to vector<1x1xf32>
    %133 = tpu.reciprocal %132 {approx = true} : vector<1x1xf32> -> vector<1x1xf32>
    %134 = vector.broadcast %133 : vector<1x1xf32> to vector<1x128xf32>
    %135 = arith.mulf %130, %134 : vector<1x128xf32>
    %136 = vector.broadcast %127 : vector<1x1xf32> to vector<1x128xf32>
    %137 = arith.subf %125, %136 : vector<1x128xf32>
    %138 = math.log %132 : vector<1x1xf32>
    %139 = vector.broadcast %138 : vector<1x1xf32> to vector<1x128xf32>
    %140 = arith.subf %137, %139 : vector<1x128xf32>
    %c1 = arith.constant 1 : index
    %c0_39 = arith.constant 0 : index
    %141 = vector.load %arg1[%c1, %c0_39] : memref<8x128xf32, #tpu.memory_space<vmem>>, vector<1x128xf32>
    %142 = arith.addf %125, %141 : vector<1x128xf32>
    %cst_40 = arith.constant dense<0xFF800000> : vector<1xf32>
    %143 = vector.multi_reduction <maximumf>, %142, %cst_40 [1] : vector<1x128xf32> to vector<1xf32>
    %144 = vector.shape_cast %143 : vector<1xf32> to vector<1x1xf32>
    %145 = vector.broadcast %144 : vector<1x1xf32> to vector<1x128xf32>
    %146 = arith.cmpf oge, %142, %145 : vector<1x128xf32>
    %cst_41 = arith.constant 1.280000e+02 : f32
    %147 = vector.broadcast %cst_41 : f32 to vector<1x128xf32>
    %148 = arith.select %146, %8, %147 : vector<1x128xi1>, vector<1x128xf32>
    %cst_42 = arith.constant dense<0x7F800000> : vector<1xf32>
    %149 = vector.multi_reduction <minimumf>, %148, %cst_42 [1] : vector<1x128xf32> to vector<1xf32>
    %150 = vector.shape_cast %149 : vector<1xf32> to vector<1x1xf32>
    %151 = arith.fptosi %150 : vector<1x1xf32> to vector<1x1xi32>
    %152 = vector.broadcast %151 : vector<1x1xi32> to vector<1x128xi32>
    %153 = arith.cmpi eq, %7, %152 : vector<1x128xi32>
    %154 = arith.extui %153 : vector<1x128xi1> to vector<1x128xi32>
    %155 = arith.sitofp %154 : vector<1x128xi32> to vector<1x128xf32>
    %156 = arith.mulf %155, %140 : vector<1x128xf32>
    %cst_43 = arith.constant dense<0.000000e+00> : vector<1xf32>
    %157 = vector.multi_reduction <add>, %156, %cst_43 [1] : vector<1x128xf32> to vector<1xf32>
    %158 = vector.shape_cast %157 : vector<1xf32> to vector<1x1xf32>
    %159 = arith.addf %73, %158 : vector<1x1xf32>
    %160 = arith.mulf %135, %140 : vector<1x128xf32>
    %cst_44 = arith.constant dense<0.000000e+00> : vector<1xf32>
    %161 = vector.multi_reduction <add>, %160, %cst_44 [1] : vector<1x128xf32> to vector<1xf32>
    %162 = vector.shape_cast %161 : vector<1xf32> to vector<1x1xf32>
    %163 = arith.subf %77, %162 : vector<1x1xf32>
    %164 = vector.broadcast %151 : vector<1x1xi32> to vector<8x1xi32>
    %165 = arith.cmpi eq, %9, %164 : vector<8x1xi32>
    %cst_45 = arith.constant 0.000000e+00 : f32
    %166 = vector.shape_cast %165 : vector<8x1xi1> to vector<8x1xi1>
    %167 = vector.broadcast %166 : vector<8x1xi1> to vector<8x128xi1>
    %168 = vector.broadcast %cst_45 : f32 to vector<8x128xf32>
    %169 = arith.select %167, %0, %168 : vector<8x128xi1>, vector<8x128xf32>
    %cst_46 = arith.constant dense<0.000000e+00> : vector<128xf32>
    %170 = vector.multi_reduction <add>, %169, %cst_46 [0] : vector<8x128xf32> to vector<128xf32>
    %171 = vector.shape_cast %170 : vector<128xf32> to vector<1x128xf32>
    %c1_i32 = arith.constant 1 : i32
    %172 = vector.broadcast %c1_i32 : i32 to vector<8x128xi32>
    %173 = arith.cmpi eq, %10, %172 : vector<8x128xi32>
    %174 = vector.shape_cast %135 : vector<1x128xf32> to vector<1x128xf32>
    %175 = vector.broadcast %174 : vector<1x128xf32> to vector<8x128xf32>
    %176 = arith.select %173, %175, %98 : vector<8x128xi1>, vector<8x128xf32>
    %c7_i32_47 = arith.constant 7 : i32
    %177 = vector.broadcast %c7_i32_47 : i32 to vector<8x128xi32>
    %178 = arith.cmpi eq, %10, %177 : vector<8x128xi32>
    %c1_i32_48 = arith.constant 1 : i32
    %179 = vector.broadcast %c1_i32_48 : i32 to vector<8x128xi32>
    %180 = arith.cmpi eq, %11, %179 : vector<8x128xi32>
    %181 = arith.andi %178, %180 : vector<8x128xi1>
    %182 = vector.shape_cast %150 : vector<1x1xf32> to vector<1x1xf32>
    %183 = vector.broadcast %182 : vector<1x1xf32> to vector<8x128xf32>
    %184 = arith.select %181, %183, %176 : vector<8x128xi1>, vector<8x128xf32>
    %cst_49 = arith.constant dense<0.000000e+00> : vector<1x128xf32>
    %185 = tpu.matmul %123, %1, %cst_49 {dimension_numbers = #tpu.dot_dimension_numbers<[1], [0], [0], [1], [0, 0, 1, 1], [], []>} : vector<1x32xf32>, vector<32x128xf32>, vector<1x128xf32> -> vector<1x128xf32>
    %186 = arith.addf %171, %185 : vector<1x128xf32>
    %187 = arith.addf %186, %2 : vector<1x128xf32>
    %188 = math.tanh %187 : vector<1x128xf32>
    %189 = vector.extract_strided_slice %188 {offsets = [0, 0], sizes = [1, 32], strides = [1, 1]} : vector<1x128xf32> to vector<1x32xf32>
    %cst_50 = arith.constant 5.000000e-01 : f32
    %190 = vector.broadcast %cst_50 : f32 to vector<1x32xf32>
    %191 = arith.mulf %190, %189 : vector<1x32xf32>
    %cst_51 = arith.constant 5.000000e-01 : f32
    %192 = vector.broadcast %cst_51 : f32 to vector<1x32xf32>
    %193 = arith.addf %191, %192 : vector<1x32xf32>
    %194 = vector.extract_strided_slice %188 {offsets = [0, 32], sizes = [1, 32], strides = [1, 1]} : vector<1x128xf32> to vector<1x32xf32>
    %cst_52 = arith.constant 5.000000e-01 : f32
    %195 = vector.broadcast %cst_52 : f32 to vector<1x32xf32>
    %196 = arith.mulf %195, %194 : vector<1x32xf32>
    %cst_53 = arith.constant 5.000000e-01 : f32
    %197 = vector.broadcast %cst_53 : f32 to vector<1x32xf32>
    %198 = arith.addf %196, %197 : vector<1x32xf32>
    %199 = vector.extract_strided_slice %188 {offsets = [0, 64], sizes = [1, 32], strides = [1, 1]} : vector<1x128xf32> to vector<1x32xf32>
    %200 = vector.extract_strided_slice %188 {offsets = [0, 96], sizes = [1, 32], strides = [1, 1]} : vector<1x128xf32> to vector<1x32xf32>
    %cst_54 = arith.constant 5.000000e-01 : f32
    %201 = vector.broadcast %cst_54 : f32 to vector<1x32xf32>
    %202 = arith.mulf %201, %200 : vector<1x32xf32>
    %cst_55 = arith.constant 5.000000e-01 : f32
    %203 = vector.broadcast %cst_55 : f32 to vector<1x32xf32>
    %204 = arith.addf %202, %203 : vector<1x32xf32>
    %205 = arith.mulf %198, %121 : vector<1x32xf32>
    %206 = arith.mulf %193, %199 : vector<1x32xf32>
    %207 = arith.addf %205, %206 : vector<1x32xf32>
    %208 = math.tanh %207 : vector<1x32xf32>
    %209 = arith.mulf %204, %208 : vector<1x32xf32>
    %cst_56 = arith.constant dense<0.000000e+00> : vector<1x128xf32>
    %210 = tpu.matmul %209, %5, %cst_56 {dimension_numbers = #tpu.dot_dimension_numbers<[1], [0], [0], [1], [0, 0, 1, 1], [], []>} : vector<1x32xf32>, vector<32x128xf32>, vector<1x128xf32> -> vector<1x128xf32>
    %211 = arith.addf %210, %3 : vector<1x128xf32>
    %cst_57 = arith.constant dense<0xFF800000> : vector<1xf32>
    %212 = vector.multi_reduction <maximumf>, %211, %cst_57 [1] : vector<1x128xf32> to vector<1xf32>
    %213 = vector.shape_cast %212 : vector<1xf32> to vector<1x1xf32>
    %214 = vector.broadcast %213 : vector<1x1xf32> to vector<1x128xf32>
    %215 = arith.subf %211, %214 : vector<1x128xf32>
    %216 = math.exp %215 : vector<1x128xf32>
    %cst_58 = arith.constant dense<0.000000e+00> : vector<1xf32>
    %217 = vector.multi_reduction <add>, %216, %cst_58 [1] : vector<1x128xf32> to vector<1xf32>
    %218 = vector.shape_cast %217 : vector<1xf32> to vector<1x1xf32>
    %219 = tpu.reciprocal %218 {approx = true} : vector<1x1xf32> -> vector<1x1xf32>
    %220 = vector.broadcast %219 : vector<1x1xf32> to vector<1x128xf32>
    %221 = arith.mulf %216, %220 : vector<1x128xf32>
    %222 = vector.broadcast %213 : vector<1x1xf32> to vector<1x128xf32>
    %223 = arith.subf %211, %222 : vector<1x128xf32>
    %224 = math.log %218 : vector<1x1xf32>
    %225 = vector.broadcast %224 : vector<1x1xf32> to vector<1x128xf32>
    %226 = arith.subf %223, %225 : vector<1x128xf32>
    %c2 = arith.constant 2 : index
    %c0_59 = arith.constant 0 : index
    %227 = vector.load %arg1[%c2, %c0_59] : memref<8x128xf32, #tpu.memory_space<vmem>>, vector<1x128xf32>
    %228 = arith.addf %211, %227 : vector<1x128xf32>
    %cst_60 = arith.constant dense<0xFF800000> : vector<1xf32>
    %229 = vector.multi_reduction <maximumf>, %228, %cst_60 [1] : vector<1x128xf32> to vector<1xf32>
    %230 = vector.shape_cast %229 : vector<1xf32> to vector<1x1xf32>
    %231 = vector.broadcast %230 : vector<1x1xf32> to vector<1x128xf32>
    %232 = arith.cmpf oge, %228, %231 : vector<1x128xf32>
    %cst_61 = arith.constant 1.280000e+02 : f32
    %233 = vector.broadcast %cst_61 : f32 to vector<1x128xf32>
    %234 = arith.select %232, %8, %233 : vector<1x128xi1>, vector<1x128xf32>
    %cst_62 = arith.constant dense<0x7F800000> : vector<1xf32>
    %235 = vector.multi_reduction <minimumf>, %234, %cst_62 [1] : vector<1x128xf32> to vector<1xf32>
    %236 = vector.shape_cast %235 : vector<1xf32> to vector<1x1xf32>
    %237 = arith.fptosi %236 : vector<1x1xf32> to vector<1x1xi32>
    %238 = vector.broadcast %237 : vector<1x1xi32> to vector<1x128xi32>
    %239 = arith.cmpi eq, %7, %238 : vector<1x128xi32>
    %240 = arith.extui %239 : vector<1x128xi1> to vector<1x128xi32>
    %241 = arith.sitofp %240 : vector<1x128xi32> to vector<1x128xf32>
    %242 = arith.mulf %241, %226 : vector<1x128xf32>
    %cst_63 = arith.constant dense<0.000000e+00> : vector<1xf32>
    %243 = vector.multi_reduction <add>, %242, %cst_63 [1] : vector<1x128xf32> to vector<1xf32>
    %244 = vector.shape_cast %243 : vector<1xf32> to vector<1x1xf32>
    %245 = arith.addf %159, %244 : vector<1x1xf32>
    %246 = arith.mulf %221, %226 : vector<1x128xf32>
    %cst_64 = arith.constant dense<0.000000e+00> : vector<1xf32>
    %247 = vector.multi_reduction <add>, %246, %cst_64 [1] : vector<1x128xf32> to vector<1xf32>
    %248 = vector.shape_cast %247 : vector<1xf32> to vector<1x1xf32>
    %249 = arith.subf %163, %248 : vector<1x1xf32>
    %250 = vector.broadcast %237 : vector<1x1xi32> to vector<8x1xi32>
    %251 = arith.cmpi eq, %9, %250 : vector<8x1xi32>
    %cst_65 = arith.constant 0.000000e+00 : f32
    %252 = vector.shape_cast %251 : vector<8x1xi1> to vector<8x1xi1>
    %253 = vector.broadcast %252 : vector<8x1xi1> to vector<8x128xi1>
    %254 = vector.broadcast %cst_65 : f32 to vector<8x128xf32>
    %255 = arith.select %253, %0, %254 : vector<8x128xi1>, vector<8x128xf32>
    %cst_66 = arith.constant dense<0.000000e+00> : vector<128xf32>
    %256 = vector.multi_reduction <add>, %255, %cst_66 [0] : vector<8x128xf32> to vector<128xf32>
    %257 = vector.shape_cast %256 : vector<128xf32> to vector<1x128xf32>
    %c2_i32 = arith.constant 2 : i32
    %258 = vector.broadcast %c2_i32 : i32 to vector<8x128xi32>
    %259 = arith.cmpi eq, %10, %258 : vector<8x128xi32>
    %260 = vector.shape_cast %221 : vector<1x128xf32> to vector<1x128xf32>
    %261 = vector.broadcast %260 : vector<1x128xf32> to vector<8x128xf32>
    %262 = arith.select %259, %261, %184 : vector<8x128xi1>, vector<8x128xf32>
    %c7_i32_67 = arith.constant 7 : i32
    %263 = vector.broadcast %c7_i32_67 : i32 to vector<8x128xi32>
    %264 = arith.cmpi eq, %10, %263 : vector<8x128xi32>
    %c2_i32_68 = arith.constant 2 : i32
    %265 = vector.broadcast %c2_i32_68 : i32 to vector<8x128xi32>
    %266 = arith.cmpi eq, %11, %265 : vector<8x128xi32>
    %267 = arith.andi %264, %266 : vector<8x128xi1>
    %268 = vector.shape_cast %236 : vector<1x1xf32> to vector<1x1xf32>
    %269 = vector.broadcast %268 : vector<1x1xf32> to vector<8x128xf32>
    %270 = arith.select %267, %269, %262 : vector<8x128xi1>, vector<8x128xf32>
    %cst_69 = arith.constant dense<0.000000e+00> : vector<1x128xf32>
    %271 = tpu.matmul %209, %1, %cst_69 {dimension_numbers = #tpu.dot_dimension_numbers<[1], [0], [0], [1], [0, 0, 1, 1], [], []>} : vector<1x32xf32>, vector<32x128xf32>, vector<1x128xf32> -> vector<1x128xf32>
    %272 = arith.addf %257, %271 : vector<1x128xf32>
    %273 = arith.addf %272, %2 : vector<1x128xf32>
    %274 = math.tanh %273 : vector<1x128xf32>
    %275 = vector.extract_strided_slice %274 {offsets = [0, 0], sizes = [1, 32], strides = [1, 1]} : vector<1x128xf32> to vector<1x32xf32>
    %cst_70 = arith.constant 5.000000e-01 : f32
    %276 = vector.broadcast %cst_70 : f32 to vector<1x32xf32>
    %277 = arith.mulf %276, %275 : vector<1x32xf32>
    %cst_71 = arith.constant 5.000000e-01 : f32
    %278 = vector.broadcast %cst_71 : f32 to vector<1x32xf32>
    %279 = arith.addf %277, %278 : vector<1x32xf32>
    %280 = vector.extract_strided_slice %274 {offsets = [0, 32], sizes = [1, 32], strides = [1, 1]} : vector<1x128xf32> to vector<1x32xf32>
    %cst_72 = arith.constant 5.000000e-01 : f32
    %281 = vector.broadcast %cst_72 : f32 to vector<1x32xf32>
    %282 = arith.mulf %281, %280 : vector<1x32xf32>
    %cst_73 = arith.constant 5.000000e-01 : f32
    %283 = vector.broadcast %cst_73 : f32 to vector<1x32xf32>
    %284 = arith.addf %282, %283 : vector<1x32xf32>
    %285 = vector.extract_strided_slice %274 {offsets = [0, 64], sizes = [1, 32], strides = [1, 1]} : vector<1x128xf32> to vector<1x32xf32>
    %286 = vector.extract_strided_slice %274 {offsets = [0, 96], sizes = [1, 32], strides = [1, 1]} : vector<1x128xf32> to vector<1x32xf32>
    %cst_74 = arith.constant 5.000000e-01 : f32
    %287 = vector.broadcast %cst_74 : f32 to vector<1x32xf32>
    %288 = arith.mulf %287, %286 : vector<1x32xf32>
    %cst_75 = arith.constant 5.000000e-01 : f32
    %289 = vector.broadcast %cst_75 : f32 to vector<1x32xf32>
    %290 = arith.addf %288, %289 : vector<1x32xf32>
    %291 = arith.mulf %284, %207 : vector<1x32xf32>
    %292 = arith.mulf %279, %285 : vector<1x32xf32>
    %293 = arith.addf %291, %292 : vector<1x32xf32>
    %294 = math.tanh %293 : vector<1x32xf32>
    %295 = arith.mulf %290, %294 : vector<1x32xf32>
    %cst_76 = arith.constant dense<0.000000e+00> : vector<1x128xf32>
    %296 = tpu.matmul %295, %6, %cst_76 {dimension_numbers = #tpu.dot_dimension_numbers<[1], [0], [0], [1], [0, 0, 1, 1], [], []>} : vector<1x32xf32>, vector<32x128xf32>, vector<1x128xf32> -> vector<1x128xf32>
    %297 = arith.addf %296, %4 : vector<1x128xf32>
    %cst_77 = arith.constant dense<0xFF800000> : vector<1xf32>
    %298 = vector.multi_reduction <maximumf>, %297, %cst_77 [1] : vector<1x128xf32> to vector<1xf32>
    %299 = vector.shape_cast %298 : vector<1xf32> to vector<1x1xf32>
    %300 = vector.broadcast %299 : vector<1x1xf32> to vector<1x128xf32>
    %301 = arith.subf %297, %300 : vector<1x128xf32>
    %302 = math.exp %301 : vector<1x128xf32>
    %cst_78 = arith.constant dense<0.000000e+00> : vector<1xf32>
    %303 = vector.multi_reduction <add>, %302, %cst_78 [1] : vector<1x128xf32> to vector<1xf32>
    %304 = vector.shape_cast %303 : vector<1xf32> to vector<1x1xf32>
    %305 = tpu.reciprocal %304 {approx = true} : vector<1x1xf32> -> vector<1x1xf32>
    %306 = vector.broadcast %305 : vector<1x1xf32> to vector<1x128xf32>
    %307 = arith.mulf %302, %306 : vector<1x128xf32>
    %308 = vector.broadcast %299 : vector<1x1xf32> to vector<1x128xf32>
    %309 = arith.subf %297, %308 : vector<1x128xf32>
    %310 = math.log %304 : vector<1x1xf32>
    %311 = vector.broadcast %310 : vector<1x1xf32> to vector<1x128xf32>
    %312 = arith.subf %309, %311 : vector<1x128xf32>
    %c3 = arith.constant 3 : index
    %c0_79 = arith.constant 0 : index
    %313 = vector.load %arg1[%c3, %c0_79] : memref<8x128xf32, #tpu.memory_space<vmem>>, vector<1x128xf32>
    %314 = arith.addf %297, %313 : vector<1x128xf32>
    %cst_80 = arith.constant dense<0xFF800000> : vector<1xf32>
    %315 = vector.multi_reduction <maximumf>, %314, %cst_80 [1] : vector<1x128xf32> to vector<1xf32>
    %316 = vector.shape_cast %315 : vector<1xf32> to vector<1x1xf32>
    %317 = vector.broadcast %316 : vector<1x1xf32> to vector<1x128xf32>
    %318 = arith.cmpf oge, %314, %317 : vector<1x128xf32>
    %cst_81 = arith.constant 1.280000e+02 : f32
    %319 = vector.broadcast %cst_81 : f32 to vector<1x128xf32>
    %320 = arith.select %318, %8, %319 : vector<1x128xi1>, vector<1x128xf32>
    %cst_82 = arith.constant dense<0x7F800000> : vector<1xf32>
    %321 = vector.multi_reduction <minimumf>, %320, %cst_82 [1] : vector<1x128xf32> to vector<1xf32>
    %322 = vector.shape_cast %321 : vector<1xf32> to vector<1x1xf32>
    %323 = arith.fptosi %322 : vector<1x1xf32> to vector<1x1xi32>
    %324 = vector.broadcast %323 : vector<1x1xi32> to vector<1x128xi32>
    %325 = arith.cmpi eq, %7, %324 : vector<1x128xi32>
    %326 = arith.extui %325 : vector<1x128xi1> to vector<1x128xi32>
    %327 = arith.sitofp %326 : vector<1x128xi32> to vector<1x128xf32>
    %328 = arith.mulf %327, %312 : vector<1x128xf32>
    %cst_83 = arith.constant dense<0.000000e+00> : vector<1xf32>
    %329 = vector.multi_reduction <add>, %328, %cst_83 [1] : vector<1x128xf32> to vector<1xf32>
    %330 = vector.shape_cast %329 : vector<1xf32> to vector<1x1xf32>
    %331 = arith.addf %245, %330 : vector<1x1xf32>
    %332 = arith.mulf %307, %312 : vector<1x128xf32>
    %cst_84 = arith.constant dense<0.000000e+00> : vector<1xf32>
    %333 = vector.multi_reduction <add>, %332, %cst_84 [1] : vector<1x128xf32> to vector<1xf32>
    %334 = vector.shape_cast %333 : vector<1xf32> to vector<1x1xf32>
    %335 = arith.subf %249, %334 : vector<1x1xf32>
    %336 = vector.broadcast %323 : vector<1x1xi32> to vector<8x1xi32>
    %337 = arith.cmpi eq, %9, %336 : vector<8x1xi32>
    %cst_85 = arith.constant 0.000000e+00 : f32
    %338 = vector.shape_cast %337 : vector<8x1xi1> to vector<8x1xi1>
    %339 = vector.broadcast %338 : vector<8x1xi1> to vector<8x128xi1>
    %340 = vector.broadcast %cst_85 : f32 to vector<8x128xf32>
    %341 = arith.select %339, %0, %340 : vector<8x128xi1>, vector<8x128xf32>
    %cst_86 = arith.constant dense<0.000000e+00> : vector<128xf32>
    %342 = vector.multi_reduction <add>, %341, %cst_86 [0] : vector<8x128xf32> to vector<128xf32>
    %343 = vector.shape_cast %342 : vector<128xf32> to vector<1x128xf32>
    %c3_i32 = arith.constant 3 : i32
    %344 = vector.broadcast %c3_i32 : i32 to vector<8x128xi32>
    %345 = arith.cmpi eq, %10, %344 : vector<8x128xi32>
    %346 = vector.shape_cast %307 : vector<1x128xf32> to vector<1x128xf32>
    %347 = vector.broadcast %346 : vector<1x128xf32> to vector<8x128xf32>
    %348 = arith.select %345, %347, %270 : vector<8x128xi1>, vector<8x128xf32>
    %c7_i32_87 = arith.constant 7 : i32
    %349 = vector.broadcast %c7_i32_87 : i32 to vector<8x128xi32>
    %350 = arith.cmpi eq, %10, %349 : vector<8x128xi32>
    %c3_i32_88 = arith.constant 3 : i32
    %351 = vector.broadcast %c3_i32_88 : i32 to vector<8x128xi32>
    %352 = arith.cmpi eq, %11, %351 : vector<8x128xi32>
    %353 = arith.andi %350, %352 : vector<8x128xi1>
    %354 = vector.shape_cast %322 : vector<1x1xf32> to vector<1x1xf32>
    %355 = vector.broadcast %354 : vector<1x1xf32> to vector<8x128xf32>
    %356 = arith.select %353, %355, %348 : vector<8x128xi1>, vector<8x128xf32>
    %cst_89 = arith.constant dense<0.000000e+00> : vector<1x128xf32>
    %357 = tpu.matmul %295, %1, %cst_89 {dimension_numbers = #tpu.dot_dimension_numbers<[1], [0], [0], [1], [0, 0, 1, 1], [], []>} : vector<1x32xf32>, vector<32x128xf32>, vector<1x128xf32> -> vector<1x128xf32>
    %358 = arith.addf %343, %357 : vector<1x128xf32>
    %359 = arith.addf %358, %2 : vector<1x128xf32>
    %360 = math.tanh %359 : vector<1x128xf32>
    %361 = vector.extract_strided_slice %360 {offsets = [0, 0], sizes = [1, 32], strides = [1, 1]} : vector<1x128xf32> to vector<1x32xf32>
    %cst_90 = arith.constant 5.000000e-01 : f32
    %362 = vector.broadcast %cst_90 : f32 to vector<1x32xf32>
    %363 = arith.mulf %362, %361 : vector<1x32xf32>
    %cst_91 = arith.constant 5.000000e-01 : f32
    %364 = vector.broadcast %cst_91 : f32 to vector<1x32xf32>
    %365 = arith.addf %363, %364 : vector<1x32xf32>
    %366 = vector.extract_strided_slice %360 {offsets = [0, 32], sizes = [1, 32], strides = [1, 1]} : vector<1x128xf32> to vector<1x32xf32>
    %cst_92 = arith.constant 5.000000e-01 : f32
    %367 = vector.broadcast %cst_92 : f32 to vector<1x32xf32>
    %368 = arith.mulf %367, %366 : vector<1x32xf32>
    %cst_93 = arith.constant 5.000000e-01 : f32
    %369 = vector.broadcast %cst_93 : f32 to vector<1x32xf32>
    %370 = arith.addf %368, %369 : vector<1x32xf32>
    %371 = vector.extract_strided_slice %360 {offsets = [0, 64], sizes = [1, 32], strides = [1, 1]} : vector<1x128xf32> to vector<1x32xf32>
    %372 = vector.extract_strided_slice %360 {offsets = [0, 96], sizes = [1, 32], strides = [1, 1]} : vector<1x128xf32> to vector<1x32xf32>
    %cst_94 = arith.constant 5.000000e-01 : f32
    %373 = vector.broadcast %cst_94 : f32 to vector<1x32xf32>
    %374 = arith.mulf %373, %372 : vector<1x32xf32>
    %cst_95 = arith.constant 5.000000e-01 : f32
    %375 = vector.broadcast %cst_95 : f32 to vector<1x32xf32>
    %376 = arith.addf %374, %375 : vector<1x32xf32>
    %377 = arith.mulf %370, %293 : vector<1x32xf32>
    %378 = arith.mulf %365, %371 : vector<1x32xf32>
    %379 = arith.addf %377, %378 : vector<1x32xf32>
    %380 = math.tanh %379 : vector<1x32xf32>
    %381 = arith.mulf %376, %380 : vector<1x32xf32>
    %cst_96 = arith.constant dense<0.000000e+00> : vector<1x128xf32>
    %382 = tpu.matmul %381, %5, %cst_96 {dimension_numbers = #tpu.dot_dimension_numbers<[1], [0], [0], [1], [0, 0, 1, 1], [], []>} : vector<1x32xf32>, vector<32x128xf32>, vector<1x128xf32> -> vector<1x128xf32>
    %383 = arith.addf %382, %3 : vector<1x128xf32>
    %cst_97 = arith.constant dense<0xFF800000> : vector<1xf32>
    %384 = vector.multi_reduction <maximumf>, %383, %cst_97 [1] : vector<1x128xf32> to vector<1xf32>
    %385 = vector.shape_cast %384 : vector<1xf32> to vector<1x1xf32>
    %386 = vector.broadcast %385 : vector<1x1xf32> to vector<1x128xf32>
    %387 = arith.subf %383, %386 : vector<1x128xf32>
    %388 = math.exp %387 : vector<1x128xf32>
    %cst_98 = arith.constant dense<0.000000e+00> : vector<1xf32>
    %389 = vector.multi_reduction <add>, %388, %cst_98 [1] : vector<1x128xf32> to vector<1xf32>
    %390 = vector.shape_cast %389 : vector<1xf32> to vector<1x1xf32>
    %391 = tpu.reciprocal %390 {approx = true} : vector<1x1xf32> -> vector<1x1xf32>
    %392 = vector.broadcast %391 : vector<1x1xf32> to vector<1x128xf32>
    %393 = arith.mulf %388, %392 : vector<1x128xf32>
    %394 = vector.broadcast %385 : vector<1x1xf32> to vector<1x128xf32>
    %395 = arith.subf %383, %394 : vector<1x128xf32>
    %396 = math.log %390 : vector<1x1xf32>
    %397 = vector.broadcast %396 : vector<1x1xf32> to vector<1x128xf32>
    %398 = arith.subf %395, %397 : vector<1x128xf32>
    %c4 = arith.constant 4 : index
    %c0_99 = arith.constant 0 : index
    %399 = vector.load %arg1[%c4, %c0_99] : memref<8x128xf32, #tpu.memory_space<vmem>>, vector<1x128xf32>
    %400 = arith.addf %383, %399 : vector<1x128xf32>
    %cst_100 = arith.constant dense<0xFF800000> : vector<1xf32>
    %401 = vector.multi_reduction <maximumf>, %400, %cst_100 [1] : vector<1x128xf32> to vector<1xf32>
    %402 = vector.shape_cast %401 : vector<1xf32> to vector<1x1xf32>
    %403 = vector.broadcast %402 : vector<1x1xf32> to vector<1x128xf32>
    %404 = arith.cmpf oge, %400, %403 : vector<1x128xf32>
    %cst_101 = arith.constant 1.280000e+02 : f32
    %405 = vector.broadcast %cst_101 : f32 to vector<1x128xf32>
    %406 = arith.select %404, %8, %405 : vector<1x128xi1>, vector<1x128xf32>
    %cst_102 = arith.constant dense<0x7F800000> : vector<1xf32>
    %407 = vector.multi_reduction <minimumf>, %406, %cst_102 [1] : vector<1x128xf32> to vector<1xf32>
    %408 = vector.shape_cast %407 : vector<1xf32> to vector<1x1xf32>
    %409 = arith.fptosi %408 : vector<1x1xf32> to vector<1x1xi32>
    %410 = vector.broadcast %409 : vector<1x1xi32> to vector<1x128xi32>
    %411 = arith.cmpi eq, %7, %410 : vector<1x128xi32>
    %412 = arith.extui %411 : vector<1x128xi1> to vector<1x128xi32>
    %413 = arith.sitofp %412 : vector<1x128xi32> to vector<1x128xf32>
    %414 = arith.mulf %413, %398 : vector<1x128xf32>
    %cst_103 = arith.constant dense<0.000000e+00> : vector<1xf32>
    %415 = vector.multi_reduction <add>, %414, %cst_103 [1] : vector<1x128xf32> to vector<1xf32>
    %416 = vector.shape_cast %415 : vector<1xf32> to vector<1x1xf32>
    %417 = arith.addf %331, %416 : vector<1x1xf32>
    %418 = arith.mulf %393, %398 : vector<1x128xf32>
    %cst_104 = arith.constant dense<0.000000e+00> : vector<1xf32>
    %419 = vector.multi_reduction <add>, %418, %cst_104 [1] : vector<1x128xf32> to vector<1xf32>
    %420 = vector.shape_cast %419 : vector<1xf32> to vector<1x1xf32>
    %421 = arith.subf %335, %420 : vector<1x1xf32>
    %422 = vector.broadcast %409 : vector<1x1xi32> to vector<8x1xi32>
    %423 = arith.cmpi eq, %9, %422 : vector<8x1xi32>
    %cst_105 = arith.constant 0.000000e+00 : f32
    %424 = vector.shape_cast %423 : vector<8x1xi1> to vector<8x1xi1>
    %425 = vector.broadcast %424 : vector<8x1xi1> to vector<8x128xi1>
    %426 = vector.broadcast %cst_105 : f32 to vector<8x128xf32>
    %427 = arith.select %425, %0, %426 : vector<8x128xi1>, vector<8x128xf32>
    %cst_106 = arith.constant dense<0.000000e+00> : vector<128xf32>
    %428 = vector.multi_reduction <add>, %427, %cst_106 [0] : vector<8x128xf32> to vector<128xf32>
    %429 = vector.shape_cast %428 : vector<128xf32> to vector<1x128xf32>
    %c4_i32 = arith.constant 4 : i32
    %430 = vector.broadcast %c4_i32 : i32 to vector<8x128xi32>
    %431 = arith.cmpi eq, %10, %430 : vector<8x128xi32>
    %432 = vector.shape_cast %393 : vector<1x128xf32> to vector<1x128xf32>
    %433 = vector.broadcast %432 : vector<1x128xf32> to vector<8x128xf32>
    %434 = arith.select %431, %433, %356 : vector<8x128xi1>, vector<8x128xf32>
    %c7_i32_107 = arith.constant 7 : i32
    %435 = vector.broadcast %c7_i32_107 : i32 to vector<8x128xi32>
    %436 = arith.cmpi eq, %10, %435 : vector<8x128xi32>
    %c4_i32_108 = arith.constant 4 : i32
    %437 = vector.broadcast %c4_i32_108 : i32 to vector<8x128xi32>
    %438 = arith.cmpi eq, %11, %437 : vector<8x128xi32>
    %439 = arith.andi %436, %438 : vector<8x128xi1>
    %440 = vector.shape_cast %408 : vector<1x1xf32> to vector<1x1xf32>
    %441 = vector.broadcast %440 : vector<1x1xf32> to vector<8x128xf32>
    %442 = arith.select %439, %441, %434 : vector<8x128xi1>, vector<8x128xf32>
    %cst_109 = arith.constant dense<0.000000e+00> : vector<1x128xf32>
    %443 = tpu.matmul %381, %1, %cst_109 {dimension_numbers = #tpu.dot_dimension_numbers<[1], [0], [0], [1], [0, 0, 1, 1], [], []>} : vector<1x32xf32>, vector<32x128xf32>, vector<1x128xf32> -> vector<1x128xf32>
    %444 = arith.addf %429, %443 : vector<1x128xf32>
    %445 = arith.addf %444, %2 : vector<1x128xf32>
    %446 = math.tanh %445 : vector<1x128xf32>
    %447 = vector.extract_strided_slice %446 {offsets = [0, 0], sizes = [1, 32], strides = [1, 1]} : vector<1x128xf32> to vector<1x32xf32>
    %cst_110 = arith.constant 5.000000e-01 : f32
    %448 = vector.broadcast %cst_110 : f32 to vector<1x32xf32>
    %449 = arith.mulf %448, %447 : vector<1x32xf32>
    %cst_111 = arith.constant 5.000000e-01 : f32
    %450 = vector.broadcast %cst_111 : f32 to vector<1x32xf32>
    %451 = arith.addf %449, %450 : vector<1x32xf32>
    %452 = vector.extract_strided_slice %446 {offsets = [0, 32], sizes = [1, 32], strides = [1, 1]} : vector<1x128xf32> to vector<1x32xf32>
    %cst_112 = arith.constant 5.000000e-01 : f32
    %453 = vector.broadcast %cst_112 : f32 to vector<1x32xf32>
    %454 = arith.mulf %453, %452 : vector<1x32xf32>
    %cst_113 = arith.constant 5.000000e-01 : f32
    %455 = vector.broadcast %cst_113 : f32 to vector<1x32xf32>
    %456 = arith.addf %454, %455 : vector<1x32xf32>
    %457 = vector.extract_strided_slice %446 {offsets = [0, 64], sizes = [1, 32], strides = [1, 1]} : vector<1x128xf32> to vector<1x32xf32>
    %458 = vector.extract_strided_slice %446 {offsets = [0, 96], sizes = [1, 32], strides = [1, 1]} : vector<1x128xf32> to vector<1x32xf32>
    %cst_114 = arith.constant 5.000000e-01 : f32
    %459 = vector.broadcast %cst_114 : f32 to vector<1x32xf32>
    %460 = arith.mulf %459, %458 : vector<1x32xf32>
    %cst_115 = arith.constant 5.000000e-01 : f32
    %461 = vector.broadcast %cst_115 : f32 to vector<1x32xf32>
    %462 = arith.addf %460, %461 : vector<1x32xf32>
    %463 = arith.mulf %456, %379 : vector<1x32xf32>
    %464 = arith.mulf %451, %457 : vector<1x32xf32>
    %465 = arith.addf %463, %464 : vector<1x32xf32>
    %466 = math.tanh %465 : vector<1x32xf32>
    %467 = arith.mulf %462, %466 : vector<1x32xf32>
    %cst_116 = arith.constant dense<0.000000e+00> : vector<1x128xf32>
    %468 = tpu.matmul %467, %6, %cst_116 {dimension_numbers = #tpu.dot_dimension_numbers<[1], [0], [0], [1], [0, 0, 1, 1], [], []>} : vector<1x32xf32>, vector<32x128xf32>, vector<1x128xf32> -> vector<1x128xf32>
    %469 = arith.addf %468, %4 : vector<1x128xf32>
    %cst_117 = arith.constant dense<0xFF800000> : vector<1xf32>
    %470 = vector.multi_reduction <maximumf>, %469, %cst_117 [1] : vector<1x128xf32> to vector<1xf32>
    %471 = vector.shape_cast %470 : vector<1xf32> to vector<1x1xf32>
    %472 = vector.broadcast %471 : vector<1x1xf32> to vector<1x128xf32>
    %473 = arith.subf %469, %472 : vector<1x128xf32>
    %474 = math.exp %473 : vector<1x128xf32>
    %cst_118 = arith.constant dense<0.000000e+00> : vector<1xf32>
    %475 = vector.multi_reduction <add>, %474, %cst_118 [1] : vector<1x128xf32> to vector<1xf32>
    %476 = vector.shape_cast %475 : vector<1xf32> to vector<1x1xf32>
    %477 = tpu.reciprocal %476 {approx = true} : vector<1x1xf32> -> vector<1x1xf32>
    %478 = vector.broadcast %477 : vector<1x1xf32> to vector<1x128xf32>
    %479 = arith.mulf %474, %478 : vector<1x128xf32>
    %480 = vector.broadcast %471 : vector<1x1xf32> to vector<1x128xf32>
    %481 = arith.subf %469, %480 : vector<1x128xf32>
    %482 = math.log %476 : vector<1x1xf32>
    %483 = vector.broadcast %482 : vector<1x1xf32> to vector<1x128xf32>
    %484 = arith.subf %481, %483 : vector<1x128xf32>
    %c5 = arith.constant 5 : index
    %c0_119 = arith.constant 0 : index
    %485 = vector.load %arg1[%c5, %c0_119] : memref<8x128xf32, #tpu.memory_space<vmem>>, vector<1x128xf32>
    %486 = arith.addf %469, %485 : vector<1x128xf32>
    %cst_120 = arith.constant dense<0xFF800000> : vector<1xf32>
    %487 = vector.multi_reduction <maximumf>, %486, %cst_120 [1] : vector<1x128xf32> to vector<1xf32>
    %488 = vector.shape_cast %487 : vector<1xf32> to vector<1x1xf32>
    %489 = vector.broadcast %488 : vector<1x1xf32> to vector<1x128xf32>
    %490 = arith.cmpf oge, %486, %489 : vector<1x128xf32>
    %cst_121 = arith.constant 1.280000e+02 : f32
    %491 = vector.broadcast %cst_121 : f32 to vector<1x128xf32>
    %492 = arith.select %490, %8, %491 : vector<1x128xi1>, vector<1x128xf32>
    %cst_122 = arith.constant dense<0x7F800000> : vector<1xf32>
    %493 = vector.multi_reduction <minimumf>, %492, %cst_122 [1] : vector<1x128xf32> to vector<1xf32>
    %494 = vector.shape_cast %493 : vector<1xf32> to vector<1x1xf32>
    %495 = arith.fptosi %494 : vector<1x1xf32> to vector<1x1xi32>
    %496 = vector.broadcast %495 : vector<1x1xi32> to vector<1x128xi32>
    %497 = arith.cmpi eq, %7, %496 : vector<1x128xi32>
    %498 = arith.extui %497 : vector<1x128xi1> to vector<1x128xi32>
    %499 = arith.sitofp %498 : vector<1x128xi32> to vector<1x128xf32>
    %500 = arith.mulf %499, %484 : vector<1x128xf32>
    %cst_123 = arith.constant dense<0.000000e+00> : vector<1xf32>
    %501 = vector.multi_reduction <add>, %500, %cst_123 [1] : vector<1x128xf32> to vector<1xf32>
    %502 = vector.shape_cast %501 : vector<1xf32> to vector<1x1xf32>
    %503 = arith.addf %417, %502 : vector<1x1xf32>
    %504 = arith.mulf %479, %484 : vector<1x128xf32>
    %cst_124 = arith.constant dense<0.000000e+00> : vector<1xf32>
    %505 = vector.multi_reduction <add>, %504, %cst_124 [1] : vector<1x128xf32> to vector<1xf32>
    %506 = vector.shape_cast %505 : vector<1xf32> to vector<1x1xf32>
    %507 = arith.subf %421, %506 : vector<1x1xf32>
    %c5_i32 = arith.constant 5 : i32
    %508 = vector.broadcast %c5_i32 : i32 to vector<8x128xi32>
    %509 = arith.cmpi eq, %10, %508 : vector<8x128xi32>
    %510 = vector.shape_cast %479 : vector<1x128xf32> to vector<1x128xf32>
    %511 = vector.broadcast %510 : vector<1x128xf32> to vector<8x128xf32>
    %512 = arith.select %509, %511, %442 : vector<8x128xi1>, vector<8x128xf32>
    %c7_i32_125 = arith.constant 7 : i32
    %513 = vector.broadcast %c7_i32_125 : i32 to vector<8x128xi32>
    %514 = arith.cmpi eq, %10, %513 : vector<8x128xi32>
    %c5_i32_126 = arith.constant 5 : i32
    %515 = vector.broadcast %c5_i32_126 : i32 to vector<8x128xi32>
    %516 = arith.cmpi eq, %11, %515 : vector<8x128xi32>
    %517 = arith.andi %514, %516 : vector<8x128xi1>
    %518 = vector.shape_cast %494 : vector<1x1xf32> to vector<1x1xf32>
    %519 = vector.broadcast %518 : vector<1x1xf32> to vector<8x128xf32>
    %520 = arith.select %517, %519, %512 : vector<8x128xi1>, vector<8x128xf32>
    %c6_i32 = arith.constant 6 : i32
    %521 = vector.broadcast %c6_i32 : i32 to vector<8x128xi32>
    %522 = arith.cmpi eq, %10, %521 : vector<8x128xi32>
    %c0_i32_127 = arith.constant 0 : i32
    %523 = vector.broadcast %c0_i32_127 : i32 to vector<8x128xi32>
    %524 = arith.cmpi eq, %11, %523 : vector<8x128xi32>
    %525 = arith.andi %522, %524 : vector<8x128xi1>
    %526 = vector.shape_cast %503 : vector<1x1xf32> to vector<1x1xf32>
    %527 = vector.broadcast %526 : vector<1x1xf32> to vector<8x128xf32>
    %528 = arith.select %525, %527, %520 : vector<8x128xi1>, vector<8x128xf32>
    %c6_i32_128 = arith.constant 6 : i32
    %529 = vector.broadcast %c6_i32_128 : i32 to vector<8x128xi32>
    %530 = arith.cmpi eq, %10, %529 : vector<8x128xi32>
    %c1_i32_129 = arith.constant 1 : i32
    %531 = vector.broadcast %c1_i32_129 : i32 to vector<8x128xi32>
    %532 = arith.cmpi eq, %11, %531 : vector<8x128xi32>
    %533 = arith.andi %530, %532 : vector<8x128xi1>
    %534 = vector.shape_cast %507 : vector<1x1xf32> to vector<1x1xf32>
    %535 = vector.broadcast %534 : vector<1x1xf32> to vector<8x128xf32>
    %536 = arith.select %533, %535, %528 : vector<8x128xi1>, vector<8x128xf32>
    %c0_130 = arith.constant 0 : index
    %c0_131 = arith.constant 0 : index
    %537 = vector.load %arg2[%c0_130, %c0_131] : memref<8x128xf32, #tpu.memory_space<vmem>>, vector<8x128xf32>
    tpu.vector_store %arg2[%c0_130, %c0_131], %536 {strides = array<i32>} : memref<8x128xf32, #tpu.memory_space<vmem>>, vector<8x128xf32>,
    return
  }
}

</mosaic_0001>

<bundles_post_ra>
// kernel: controller_forward.1
= control target key start
LH: loop header
LB: loop body
LE: loop exit
PB: predicated region body
PF: predicated region fallthrough
CT: control target
= control target key end

     0   :  { %7 = vsyncpa [#allocation3], 0  ;;  %s908_s12 = smov [#allocation2]   ;;  %s909_s14 = smov 128   ;;  %s1276_s0 = inlined_call_operand.hbm [shape: f32[112,128], index: 0, kind: input, shape index: {}]   ;;  %s1277_s1 = inlined_call_operand.vmem [shape: f32[8,128], index: 1, kind: input, shape index: {}]   ;;  %s1278_s2 = inlined_call_operand.vmem [shape: f32[8,128], index: 2, kind: output, shape index: {}]  }
   0x1   :  { %s12_s11 = sshll.u32 %s1276_s0, 4  ;;  %s14_s13 = sshll.u32 %s908_s12, 4  ;;  %s13_s11 = int_to_ptr.hbm [resolvable:$true] %s12_s11  ;;  %s15_s13 = int_to_ptr.vmem [resolvable:$true] %s14_s13 }
   0x2   :  { %s910_s15 = smov 8  }
   0x3   :  { %20 = dma.hbm_to_vmem [thread:$0]  %s13_s11, 1792, %s15_s13, [#allocation3], %s909_s14, %s909_s14, %s910_s15  }
   0x4   :  { %906 = dma.done.wait [#allocation3], 1792  }
   0x5   :  { %907 = vsyncadd [#allocation3], 4294965504  ;;  %v932_v0 = vld [vmem:[#allocation2 + $0x28] sm:$0x1]  ;;  %s911_s16 = smov 64   ;;  %s912_s0 = smov 32   ;;  %v43_v27 = vlaneseq }
   0x6   :  { %822 = vtanh.f32 %v932_v0  ;;  %v38_v10 = vld [vmem:[#allocation2 + $0x48] sm:$0xff]  ;;  %v31_v11 = vld [vmem:[#allocation2 + $0x20] sm:$0xff]  ;;  %v30_v13 = vld [vmem:[#allocation2 + $0x18] sm:$0xff]  ;;  %vm71_vm0 = vcmask 261120   ;;  %vm94_vm1 = vcmask 1040384  }
   0x7   :  { %v37_v12 = vld [vmem:[#allocation2 + $0x40] sm:$0xff]  ;;  %86 = vmatpush.msra.mxu0 %v38_v10  ;;  %164 = vmatpush.msra.mxu1 %v31_v11  ;;  %v36_v14 = vld [vmem:[#allocation2 + $0x38] sm:$0xff]  ;;  %v29_v15 = vld [vmem:[#allocation2 + $0x10] sm:$0xff]  ;;  %v954_v28 = vand.u32 127, %v43_v27  ;;  %v968_v37 = vshrl.u32 %v43_v27, 7 }
   0x8   :  { %287 = vmatpush.msra.mxu3 %v31_v11  ;;  %v35_v16 = vld [vmem:[#allocation2 + $0x30] sm:$0xff]  ;;  %v28_v19 = vld [vmem:[#allocation2 + $0x8] sm:$0xff]  ;;  %v109_v23 = vld [vmem:[%s1277_s1] sm:$0x1] }
   0x9   :  { %87 = vmatpush.msra.mxu0 %v37_v12  ;;  %165 = vmatpush.msra.mxu1 %v30_v13  ;;  %v944_v21 = vld [vmem:[#allocation2 + $0x29] sm:$0x1]  ;;  %v957_v29 = vcvt.s32.f32 %v954_v28  ;;  %v971_v39 = vld [vmem:[#allocation2] sm:$0xff]  ;;  %v40_v62 = vld [vmem:[#allocation2 + $0x58] sm:$0xff] }
   0xa   :  { %288 = vmatpush.msra.mxu3 %v30_v13  ;;  %v42_v60 = vld [vmem:[#allocation2 + $0x68] sm:$0xff]  ;;  %v41_v61 = vld [vmem:[#allocation2 + $0x60] sm:$0xff]  ;;  %v39_v63 = vld [vmem:[#allocation2 + $0x50] sm:$0xff] }
   0xb   :  { %88 = vmatpush.msra.mxu0 %v36_v14  ;;  %166 = vmatpush.msra.mxu1 %v29_v15 }
   0xc   :  { %v823_v1 = vpop.eup %822  ;;  %289 = vmatpush.msra.mxu3 %v29_v15  ;;  %211 = vmatpush.msra.mxu2 %v42_v60 }
   0xd   :  { %53 = vrot.lane.b32.xlu0 %v823_v1, %s911_s16  ;;  %v49_v2 = vmul.f32 0.5, %v823_v1  ;;  %89 = vmatpush.msra.mxu0 %v35_v16 }
   0xe   :  { %167 = vmatpush.msra.mxu1 %v28_v19  ;;  %290 = vmatpush.msra.mxu3 %v28_v19 }
   0xf   :  { %v50_v3 = vadd.f32 0.5, %v49_v2  ;;  %334 = vmatpush.msrb.mxu0 %v38_v10  ;;  %212 = vmatpush.msra.mxu2 %v41_v61 }
  0x10   :  { %410 = vmatpush.msrb.mxu1 %v31_v11  ;;  %533 = vmatpush.msrb.mxu3 %v31_v11 }
  0x11   :  { %v51_v6 = vmul.f32 0.0, %v50_v3  ;;  %335 = vmatpush.msrb.mxu0 %v37_v12  ;;  %213 = vmatpush.msra.mxu2 %v40_v62 }
  0x12   :  { %411 = vmatpush.msrb.mxu1 %v30_v13  ;;  %534 = vmatpush.msrb.mxu3 %v30_v13 }
  0x13   :  { %336 = vmatpush.msrb.mxu0 %v36_v14  ;;  %214 = vmatpush.msra.mxu2 %v39_v63 }
  0x14   :  { %412 = vmatpush.msrb.mxu1 %v29_v15  ;;  %535 = vmatpush.msrb.mxu3 %v29_v15 }
  0x15   :  { %337 = vmatpush.msrb.mxu0 %v35_v16  ;;  %457 = vmatpush.msrb.mxu2 %v42_v60 }
  0x16   :  { %413 = vmatpush.msrb.mxu1 %v28_v19  ;;  %536 = vmatpush.msrb.mxu3 %v28_v19 }
  0x17   :  { %458 = vmatpush.msrb.mxu2 %v41_v61 }
  0x19   :  { %459 = vmatpush.msrb.mxu2 %v40_v62 }
  0x1b   :  { %460 = vmatpush.msrb.mxu2 %v39_v63 }
  0x7f   :  { %v54_v4 = vpop.permute.xlu0 %53 }
  0x80   :  { %v56_v5 = vmul.f32 %v54_v4, %v50_v3  ;;  %v988_v4 = vld [vmem:[#allocation2 + $0x2a] sm:$0x1] }
  0x82   :  { %58 = vrot.lane.b32.xlu0 %v56_v5, %s912_s0 }
  0xf4   :  { %v59_v7 = vpop.permute.xlu0 %58 }
  0xf5   :  { %v937_v8 = vadd.f32 %v59_v7, %v51_v6  ;;  %v233_v6 = vld [vmem:[%s1277_s1 + $0x1] sm:$0x1] }
  0xf7   :  { %824 = vtanh.f32 %v937_v8 }
  0xfd   :  { %v825_v9 = vpop.eup %824 }
  0xfe   :  { %64 = vrot.lane.b32.xlu1 %v825_v9, %s911_s16 }
 0x170   :  { %v65_v17 = vpop.permute.xlu1 %64 }
 0x171   :  { %v67_v18 = vmul.f32 %v65_v17, %v50_v3 }
 0x173   :  { %69 = vrot.lane.b32.xlu1 %v67_v18, %s912_s0 }
 0x1e5   :  { %v70_v20 = vpop.permute.xlu1 %69 }
 0x1e6   :  { %769 = vmatmul.msk.f32.vlgmr.msra.gmra.mxu0 %vm71_vm0, %v70_v20  ;;  %771 = vmatmul.msk.f32.vlgmr.msra.gmra.mxu1 %vm71_vm0, %v70_v20 }
 0x1e7   :  { %580 = vmatpush.msra.mxu0 %v38_v10  ;;  %656 = vmatpush.msra.mxu1 %v31_v11 }
 0x1e9   :  { %581 = vmatpush.msra.mxu0 %v37_v12  ;;  %657 = vmatpush.msra.mxu1 %v30_v13 }
 0x1eb   :  { %582 = vmatpush.msra.mxu0 %v36_v14  ;;  %658 = vmatpush.msra.mxu1 %v29_v15 }
 0x1ed   :  { %583 = vmatpush.msra.mxu0 %v35_v16  ;;  %659 = vmatpush.msra.mxu1 %v28_v19 }
 0x263   :  { %v91_v22 = vpop.f32.mrf.mxu0  ;;  %v169_v48 = vpop.f32.mrf.mxu1 }
 0x264   :  { %v950_v24 = vadd.f32 %v91_v22, %v944_v21 }
 0x266   :  { %v110_v25 = vadd.f32 %v109_v23, %v950_v24 }
 0x268   :  { %v111_v26 = vsel %vm94_vm1, %v110_v25, -inf }
 0x269   :  { %112 = vmax.xlane.f32.xlu2 %v111_v26 }
 0x2dc   :  { %v113_v30 = vpop.xlane.xlu2 %112 }
 0x2dd   :  { %vm114_vm2 = vcmp.ge.f32.partialorder %v110_v25, %v113_v30 }
 0x2de   :  { %v115_v31 = vsel %vm114_vm2, %v957_v29, 128.0 }
 0x2df   :  { %v116_v32 = vsel %vm94_vm1, %v115_v31, inf }
 0x2e0   :  { %117 = vmin.xlane.f32.xlu2 %v116_v32 }
 0x353   :  { %v961_v33 = vpop.xlane.xlu2 %117 }
 0x354   :  { %vm786_vm3 = vcmp.lt.s32.totalorder %v961_v33, 0  ;;  %v787_v34 = vceil.f32 %v961_v33  ;;  %v788_v35 = vfloor.f32 %v961_v33 }
 0x356   :  { %v966_v36 = vsel %vm786_vm3, %v787_v34, %v788_v35 }
 0x357   :  { %v790_v38 = vcvt.f32.s32 %v966_v36 }
 0x359   :  { %v133_v40 = vperm.slane %v790_v38, 0 }
 0x35b   :  { %vm134_vm4 = vcmp.eq.s32.totalorder %v968_v37, %v133_v40 }
 0x35c   :  { %v137_v41 = vsel %vm134_vm4, %v971_v39, 0.0  ;;  %vm120_vm4 = vcmp.eq.s32.totalorder %v954_v28, %v790_v38 }
 0x35d   :  { %v138_v42 = vrot.slane %v137_v41, 4 }
 0x35f   :  { %v139_v43 = vadd.f32 %v138_v42, %v137_v41 }
 0x361   :  { %v140_v44 = vrot.slane %v139_v43, 2 }
 0x363   :  { %v141_v45 = vadd.f32 %v140_v44, %v139_v43 }
 0x365   :  { %v142_v46 = vrot.slane %v141_v45, 1 }
 0x367   :  { %v143_v47 = vadd.f32 %v142_v46, %v141_v45 }
 0x369   :  { %v172_v49 = vadd.f32 %v169_v48, %v143_v47 }
 0x36b   :  { %v173_v50 = vadd.f32 %v172_v49, %v932_v0 }
 0x36d   :  { %826 = vtanh.f32 %v173_v50 }
 0x373   :  { %v827_v51 = vpop.eup %826 }
 0x374   :  { %179 = vrot.lane.b32.xlu0 %v827_v51, %s911_s16  ;;  %v175_v52 = vmul.f32 0.5, %v827_v51  ;;  %v356_v51 = vld [vmem:[%s1277_s1 + $0x2] sm:$0x1] }
 0x376   :  { %v176_v53 = vadd.f32 0.5, %v175_v52 }
 0x378   :  { %v177_v56 = vmul.f32 %v176_v53, %v937_v8 }
 0x3e6   :  { %v180_v54 = vpop.permute.xlu0 %179 }
 0x3e7   :  { %v182_v55 = vmul.f32 %v180_v54, %v176_v53 }
 0x3e9   :  { %184 = vrot.lane.b32.xlu1 %v182_v55, %s912_s0 }
 0x45b   :  { %v185_v57 = vpop.permute.xlu1 %184 }
 0x45c   :  { %v981_v58 = vadd.f32 %v185_v57, %v177_v56 }
 0x45e   :  { %828 = vtanh.f32 %v981_v58 }
 0x464   :  { %v829_v59 = vpop.eup %828 }
 0x465   :  { %190 = vrot.lane.b32.xlu2 %v829_v59, %s911_s16 }
 0x4bf   :  { %v191_v1 = vpop.permute.xlu2 %190 }
 0x4c0   :  { %v193_v2 = vmul.f32 %v191_v1, %v176_v53 }
 0x4c2   :  { %195 = vrot.lane.b32.xlu0 %v193_v2, %s912_s0 }
 0x534   :  { %v196_v3 = vpop.permute.xlu0 %195 }
 0x535   :  { %772 = vmatmul.msk.f32.vlgmr.msra.gmra.mxu2 %vm71_vm0, %v196_v3  ;;  %774 = vmatmul.msk.f32.vlgmr.msra.gmra.mxu3 %vm71_vm0, %v196_v3 }
 0x536   :  { %703 = vmatpush.msra.mxu2 %v42_v60 }
 0x538   :  { %704 = vmatpush.msra.mxu2 %v41_v61 }
 0x53a   :  { %705 = vmatpush.msra.mxu2 %v40_v62 }
 0x53c   :  { %706 = vmatpush.msra.mxu2 %v39_v63 }
 0x5b8   :  { %v216_v5 = vpop.f32.mrf.mxu2  ;;  %v292_v30 = vpop.f32.mrf.mxu3 }
 0x5b9   :  { %v994_v7 = vadd.f32 %v216_v5, %v988_v4 }
 0x5bb   :  { %v234_v8 = vadd.f32 %v233_v6, %v994_v7 }
 0x5bd   :  { %v235_v9 = vsel %vm94_vm1, %v234_v8, -inf }
 0x5be   :  { %236 = vmax.xlane.f32.xlu1 %v235_v9 }
 0x631   :  { %v237_v10 = vpop.xlane.xlu1 %236 }
 0x632   :  { %vm238_vm5 = vcmp.ge.f32.partialorder %v234_v8, %v237_v10 }
 0x633   :  { %v239_v11 = vsel %vm238_vm5, %v957_v29, 128.0  ;;  %vm147_vm5 = vcmp.eq.s32.totalorder %v968_v37, 7 }
 0x634   :  { %v240_v12 = vsel %vm94_vm1, %v239_v11, inf }
 0x635   :  { %241 = vmin.xlane.f32.xlu0 %v240_v12 }
 0x6a8   :  { %v1000_v13 = vpop.xlane.xlu0 %241 }
 0x6a9   :  { %vm791_vm6 = vcmp.lt.s32.totalorder %v1000_v13, 0  ;;  %v792_v14 = vceil.f32 %v1000_v13  ;;  %v793_v15 = vfloor.f32 %v1000_v13 }
 0x6ab   :  { %v1005_v16 = vsel %vm791_vm6, %v792_v14, %v793_v15  ;;  %vm148_vm6 = vcmp.eq.s32.totalorder %v954_v28, 0 }
 0x6ac   :  { %v795_v17 = vcvt.f32.s32 %v1005_v16 }
 0x6ae   :  { %v257_v18 = vperm.slane %v795_v17, 0  ;;  %vm244_vm3 = vcmp.eq.s32.totalorder %v954_v28, %v795_v17 }
 0x6b0   :  { %vm258_vm7 = vcmp.eq.s32.totalorder %v968_v37, %v257_v18 }
 0x6b1   :  { %v261_v19 = vsel %vm258_vm7, %v971_v39, 0.0  ;;  %vm144_vm7 = vcmp.eq.s32.totalorder %v968_v37, 0 }
 0x6b2   :  { %v262_v20 = vrot.slane %v261_v19, 4 }
 0x6b4   :  { %v263_v22 = vadd.f32 %v262_v20, %v261_v19 }
 0x6b6   :  { %v264_v23 = vrot.slane %v263_v22, 2 }
 0x6b8   :  { %v265_v25 = vadd.f32 %v264_v23, %v263_v22 }
 0x6ba   :  { %v266_v26 = vrot.slane %v265_v25, 1 }
 0x6bc   :  { %v267_v27 = vadd.f32 %v266_v26, %v265_v25 }
 0x6be   :  { %v295_v31 = vadd.f32 %v292_v30, %v267_v27 }
 0x6c0   :  { %v296_v32 = vadd.f32 %v295_v31, %v932_v0 }
 0x6c2   :  { %830 = vtanh.f32 %v296_v32 }
 0x6c8   :  { %v831_v34 = vpop.eup %830 }
 0x6c9   :  { %302 = vrot.lane.b32.xlu2 %v831_v34, %s911_s16  ;;  %v298_v35 = vmul.f32 0.5, %v831_v34  ;;  %v479_v34 = vld [vmem:[%s1277_s1 + $0x3] sm:$0x1] }
 0x6cb   :  { %v299_v40 = vadd.f32 0.5, %v298_v35 }
 0x6cd   :  { %v300_v43 = vmul.f32 %v299_v40, %v981_v58 }
 0x723   :  { %v303_v41 = vpop.permute.xlu2 %302 }
 0x724   :  { %v305_v42 = vmul.f32 %v303_v41, %v299_v40 }
 0x726   :  { %307 = vrot.lane.b32.xlu2 %v305_v42, %s912_s0 }
 0x780   :  { %v308_v44 = vpop.permute.xlu2 %307 }
 0x781   :  { %v310_v45 = vadd.f32 %v308_v44, %v300_v43 }
 0x783   :  { %832 = vtanh.f32 %v310_v45 }
 0x789   :  { %v833_v46 = vpop.eup %832 }
 0x78a   :  { %313 = vrot.lane.b32.xlu2 %v833_v46, %s911_s16 }
 0x7e4   :  { %v314_v47 = vpop.permute.xlu2 %313 }
 0x7e5   :  { %v316_v48 = vmul.f32 %v314_v47, %v299_v40 }
 0x7e7   :  { %318 = vrot.lane.b32.xlu2 %v316_v48, %s912_s0 }
 0x841   :  { %v319_v49 = vpop.permute.xlu2 %318 }
 0x842   :  { %775 = vmatmul.msk.f32.vlgmr.msrb.gmra.mxu0 %vm71_vm0, %v319_v49  ;;  %777 = vmatmul.msk.f32.vlgmr.msrb.gmra.mxu1 %vm71_vm0, %v319_v49 }
 0x8bf   :  { %v339_v50 = vpop.f32.mrf.mxu0  ;;  %v415_v10 = vpop.f32.mrf.mxu1 }
 0x8c0   :  { %v1024_v52 = vadd.f32 %v339_v50, %v944_v21 }
 0x8c2   :  { %v357_v53 = vadd.f32 %v356_v51, %v1024_v52 }
 0x8c4   :  { %v358_v54 = vsel %vm94_vm1, %v357_v53, -inf }
 0x8c5   :  { %359 = vmax.xlane.f32.xlu1 %v358_v54 }
 0x938   :  { %v360_v55 = vpop.xlane.xlu1 %359 }
 0x939   :  { %vm361_vm8 = vcmp.ge.f32.partialorder %v357_v53, %v360_v55 }
 0x93a   :  { %v362_v56 = vsel %vm361_vm8, %v957_v29, 128.0 }
 0x93b   :  { %v363_v57 = vsel %vm94_vm1, %v362_v56, inf }
 0x93c   :  { %364 = vmin.xlane.f32.xlu2 %v363_v57 }
 0x9af   :  { %v1030_v58 = vpop.xlane.xlu2 %364 }
 0x9b0   :  { %vm796_vm9 = vcmp.lt.s32.totalorder %v1030_v58, 0  ;;  %v797_v59 = vceil.f32 %v1030_v58  ;;  %v798_v60 = vfloor.f32 %v1030_v58 }
 0x9b2   :  { %v1035_v61 = vsel %vm796_vm9, %v797_v59, %v798_v60 }
 0x9b3   :  { %v800_v62 = vcvt.f32.s32 %v1035_v61 }
 0x9b5   :  { %v380_v63 = vperm.slane %v800_v62, 0  ;;  %vm1181_vm8 = vcmp.eq.s32.totalorder %v954_v28, %v800_v62 }
 0x9b7   :  { %vm381_vm10 = vcmp.eq.s32.totalorder %v968_v37, %v380_v63 }
 0x9b8   :  { %v384_v1 = vsel %vm381_vm10, %v971_v39, 0.0  ;;  %vm149_vm10 = vmand %vm147_vm5, %vm148_vm6 }
 0x9b9   :  { %v385_v2 = vrot.slane %v384_v1, 4 }
 0x9bb   :  { %v386_v3 = vadd.f32 %v385_v2, %v384_v1 }
 0x9bd   :  { %v387_v5 = vrot.slane %v386_v3, 2 }
 0x9bf   :  { %v388_v6 = vadd.f32 %v387_v5, %v386_v3 }
 0x9c1   :  { %v389_v8 = vrot.slane %v388_v6, 1 }
 0x9c3   :  { %v390_v9 = vadd.f32 %v389_v8, %v388_v6 }
 0x9c5   :  { %v418_v11 = vadd.f32 %v415_v10, %v390_v9 }
 0x9c7   :  { %v419_v12 = vadd.f32 %v418_v11, %v932_v0 }
 0x9c9   :  { %834 = vtanh.f32 %v419_v12 }
 0x9cf   :  { %v835_v14 = vpop.eup %834 }
 0x9d0   :  { %425 = vrot.lane.b32.xlu0 %v835_v14, %s911_s16  ;;  %v421_v15 = vmul.f32 0.5, %v835_v14 }
 0x9d2   :  { %v422_v18 = vadd.f32 0.5, %v421_v15 }
 0x9d4   :  { %v423_v22 = vmul.f32 %v422_v18, %v310_v45 }
 0xa42   :  { %v426_v19 = vpop.permute.xlu0 %425 }
 0xa43   :  { %v428_v20 = vmul.f32 %v426_v19, %v422_v18 }
 0xa45   :  { %430 = vrot.lane.b32.xlu1 %v428_v20, %s912_s0  ;;  %v602_v20 = vld [vmem:[%s1277_s1 + $0x4] sm:$0x1] }
 0xab7   :  { %v431_v23 = vpop.permute.xlu1 %430 }
 0xab8   :  { %v433_v25 = vadd.f32 %v431_v23, %v423_v22 }
 0xaba   :  { %836 = vtanh.f32 %v433_v25 }
 0xac0   :  { %v837_v26 = vpop.eup %836 }
 0xac1   :  { %436 = vrot.lane.b32.xlu0 %v837_v26, %s911_s16 }
 0xb33   :  { %v437_v27 = vpop.permute.xlu0 %436 }
 0xb34   :  { %v439_v30 = vmul.f32 %v437_v27, %v422_v18 }
 0xb36   :  { %441 = vrot.lane.b32.xlu1 %v439_v30, %s912_s0 }
 0xba8   :  { %v442_v31 = vpop.permute.xlu1 %441 }
 0xba9   :  { %778 = vmatmul.msk.f32.vlgmr.msrb.gmra.mxu2 %vm71_vm0, %v442_v31  ;;  %780 = vmatmul.msk.f32.vlgmr.msrb.gmra.mxu3 %vm71_vm0, %v442_v31  ;;  %v342_v31 = vsel %vm94_vm1, %v1024_v52, -inf }
 0xc2c   :  { %v462_v32 = vpop.f32.mrf.mxu2  ;;  %v538_v60 = vpop.f32.mrf.mxu3 }
 0xc2d   :  { %v1053_v35 = vadd.f32 %v462_v32, %v988_v4 }
 0xc2f   :  { %v480_v40 = vadd.f32 %v479_v34, %v1053_v35  ;;  %v465_v32 = vsel %vm94_vm1, %v1053_v35, -inf }
 0xc31   :  { %v481_v41 = vsel %vm94_vm1, %v480_v40, -inf }
 0xc32   :  { %482 = vmax.xlane.f32.xlu0 %v481_v41 }
 0xca5   :  { %v483_v42 = vpop.xlane.xlu0 %482 }
 0xca6   :  { %vm484_vm11 = vcmp.ge.f32.partialorder %v480_v40, %v483_v42 }
 0xca7   :  { %v485_v43 = vsel %vm484_vm11, %v957_v29, 128.0  ;;  %vm271_vm11 = vcmp.eq.s32.totalorder %v954_v28, 1 }
 0xca8   :  { %v486_v44 = vsel %vm94_vm1, %v485_v43, inf }
 0xca9   :  { %487 = vmin.xlane.f32.xlu1 %v486_v44 }
 0xd1c   :  { %v1059_v45 = vpop.xlane.xlu1 %487 }
 0xd1d   :  { %vm801_vm12 = vcmp.lt.s32.totalorder %v1059_v45, 0  ;;  %v802_v46 = vceil.f32 %v1059_v45  ;;  %v803_v47 = vfloor.f32 %v1059_v45 }
 0xd1f   :  { %v1064_v48 = vsel %vm801_vm12, %v802_v46, %v803_v47  ;;  %vm268_vm12 = vcmp.eq.s32.totalorder %v968_v37, 1 }
 0xd20   :  { %v805_v49 = vcvt.f32.s32 %v1064_v48 }
 0xd22   :  { %v503_v50 = vperm.slane %v805_v49, 0 }
 0xd24   :  { %vm504_vm13 = vcmp.eq.s32.totalorder %v968_v37, %v503_v50 }
 0xd25   :  { %v507_v51 = vsel %vm504_vm13, %v971_v39, 0.0  ;;  %vm394_vm13 = vcmp.eq.s32.totalorder %v954_v28, 2 }
 0xd26   :  { %v508_v53 = vrot.slane %v507_v51, 4 }
 0xd28   :  { %v509_v54 = vadd.f32 %v508_v53, %v507_v51 }
 0xd2a   :  { %v510_v55 = vrot.slane %v509_v54, 2 }
 0xd2c   :  { %v511_v56 = vadd.f32 %v510_v55, %v509_v54 }
 0xd2e   :  { %v512_v57 = vrot.slane %v511_v56, 1 }
 0xd30   :  { %v513_v59 = vadd.f32 %v512_v57, %v511_v56 }
 0xd32   :  { %v541_v63 = vadd.f32 %v538_v60, %v513_v59 }
 0xd34   :  { %v542_v1 = vadd.f32 %v541_v63, %v932_v0  ;;  %v95_v63 = vsel %vm94_vm1, %v950_v24, -inf }
 0xd36   :  { %838 = vtanh.f32 %v542_v1 }
 0xd3c   :  { %v839_v2 = vpop.eup %838 }
 0xd3d   :  { %548 = vrot.lane.b32.xlu2 %v839_v2, %s911_s16  ;;  %v544_v3 = vmul.f32 0.5, %v839_v2 }
 0xd3f   :  { %v545_v5 = vadd.f32 0.5, %v544_v3 }
 0xd41   :  { %v546_v9 = vmul.f32 %v545_v5, %v433_v25 }
 0xd97   :  { %v549_v6 = vpop.permute.xlu2 %548 }
 0xd98   :  { %v551_v8 = vmul.f32 %v549_v6, %v545_v5 }
 0xd9a   :  { %553 = vrot.lane.b32.xlu2 %v551_v8, %s912_s0 }
 0xdf4   :  { %v554_v10 = vpop.permute.xlu2 %553 }
 0xdf5   :  { %v556_v11 = vadd.f32 %v554_v10, %v546_v9 }
 0xdf7   :  { %840 = vtanh.f32 %v556_v11 }
 0xdfd   :  { %v841_v12 = vpop.eup %840 }
 0xdfe   :  { %559 = vrot.lane.b32.xlu0 %v841_v12, %s911_s16  ;;  %v219_v12 = vsel %vm94_vm1, %v994_v7, -inf }
 0xe70   :  { %v560_v14 = vpop.permute.xlu0 %559 }
 0xe71   :  { %v562_v15 = vmul.f32 %v560_v14, %v545_v5 }
 0xe73   :  { %564 = vrot.lane.b32.xlu2 %v562_v15, %s912_s0 }
 0xecd   :  { %v565_v18 = vpop.permute.xlu2 %564 }
 0xece   :  { %781 = vmatmul.msk.f32.vlgmr.msra.gmra.mxu0 %vm71_vm0, %v565_v18  ;;  %783 = vmatmul.msk.f32.vlgmr.msra.gmra.mxu1 %vm71_vm0, %v565_v18 }
 0xf4b   :  { %v585_v19 = vpop.f32.mrf.mxu0  ;;  %v661_v56 = vpop.f32.mrf.mxu1 }
 0xf4c   :  { %v586_v22 = vadd.f32 %v585_v19, %v944_v21 }
 0xf4e   :  { %v603_v23 = vadd.f32 %v602_v20, %v586_v22  ;;  %v588_v21 = vsel %vm94_vm1, %v586_v22, -inf }
 0xf50   :  { %v604_v25 = vsel %vm94_vm1, %v603_v23, -inf }
 0xf51   :  { %605 = vmax.xlane.f32.xlu1 %v604_v25 }
 0xfc4   :  { %v606_v26 = vpop.xlane.xlu1 %605 }
 0xfc5   :  { %vm607_vm14 = vcmp.ge.f32.partialorder %v603_v23, %v606_v26 }
 0xfc6   :  { %v608_v27 = vsel %vm607_vm14, %v957_v29, 128.0  ;;  %vm1206_vm14 = vmand %vm147_vm5, %vm271_vm11 }
 0xfc7   :  { %v609_v30 = vsel %vm94_vm1, %v608_v27, inf }
 0xfc8   :  { %610 = vmin.xlane.f32.xlu2 %v609_v30 }
 0xfd0   :  { %343 = vmax.xlane.f32.xlu2 %v342_v31 }
 0xfd8   :  { %466 = vmax.xlane.f32.xlu2 %v465_v32 }
 0xfe0   :  { %589 = vmax.xlane.f32.xlu2 %v588_v21 }
0x103b   :  { %v1090_v34 = vpop.xlane.xlu2 %610 }
0x103c   :  { %vm806_vm15 = vcmp.lt.s32.totalorder %v1090_v34, 0  ;;  %v807_v40 = vceil.f32 %v1090_v34  ;;  %v808_v41 = vfloor.f32 %v1090_v34 }
0x103e   :  { %v1095_v42 = vsel %vm806_vm15, %v807_v40, %v808_v41  ;;  %vm391_vm15 = vcmp.eq.s32.totalorder %v968_v37, 2 }
0x103f   :  { %v810_v43 = vcvt.f32.s32 %v1095_v42 }
0x1041   :  { %v626_v44 = vperm.slane %v810_v43, 0  ;;  %vm1188_vm9 = vcmp.eq.s32.totalorder %v954_v28, %v810_v43 }
0x1043   :  { %vm627_vm2 = vcmp.eq.s32.totalorder %v968_v37, %v626_v44  ;;  %v344_v15 = vpop.xlane.xlu2 %343 }
0x1044   :  { %v630_v46 = vsel %vm627_vm2, %v971_v39, 0.0  ;;  %v1128_v21 = vsub.f32 %v1024_v52, %v344_v15  ;;  %vm517_vm2 = vcmp.eq.s32.totalorder %v954_v28, 3 }
0x1045   :  { %v631_v47 = vrot.slane %v630_v46, 4 }
0x1046   :  { %v346_v41 = vmul.f32 1.442695, %v1128_v21 }
0x1047   :  { %v632_v50 = vadd.f32 %v631_v47, %v630_v46  ;;  %v725_v46 = vld [vmem:[%s1277_s1 + $0x5] sm:$0x1] }
0x1049   :  { %v633_v51 = vrot.slane %v632_v50, 2 }
0x104b   :  { %v634_v53 = vadd.f32 %v633_v51, %v632_v50  ;;  %v467_v18 = vpop.xlane.xlu2 %466 }
0x104c   :  { %v1137_v50 = vsub.f32 %v1053_v35, %v467_v18 }
0x104d   :  { %v635_v54 = vrot.slane %v634_v53, 1 }
0x104f   :  { %v636_v55 = vadd.f32 %v635_v54, %v634_v53  ;;  %v469_v53 = vmul.f32 1.442695, %v1137_v50 }
0x1051   :  { %v664_v57 = vadd.f32 %v661_v56, %v636_v55 }
0x1053   :  { %v665_v59 = vadd.f32 %v664_v57, %v932_v0 }
0x1055   :  { %842 = vtanh.f32 %v665_v59 }
0x105b   :  { %v843_v60 = vpop.eup %842 }
0x105c   :  { %671 = vrot.lane.b32.xlu1 %v843_v60, %s911_s16  ;;  %v667_v1 = vmul.f32 0.5, %v843_v60 }
0x105e   :  { %v668_v39 = vadd.f32 0.5, %v667_v1 }
0x1060   :  { %v669_v5 = vmul.f32 %v668_v39, %v556_v11  ;;  %v590_v11 = vpop.xlane.xlu2 %589 }
0x1061   :  { %v1113_v23 = vsub.f32 %v586_v22, %v590_v11 }
0x1063   :  { %v592_v26 = vmul.f32 1.442695, %v1113_v23 }
0x1086   :  { %96 = vmax.xlane.f32.xlu1 %v95_v63 }
0x10ce   :  { %v672_v2 = vpop.permute.xlu1 %671 }
0x10cf   :  { %v674_v3 = vmul.f32 %v672_v2, %v668_v39 }
0x10d1   :  { %676 = vrot.lane.b32.xlu0 %v674_v3, %s912_s0 }
0x1143   :  { %v677_v6 = vpop.permute.xlu0 %676 }
0x1144   :  { %v679_v8 = vadd.f32 %v677_v6, %v669_v5 }
0x1146   :  { %844 = vtanh.f32 %v679_v8 }
0x114c   :  { %v845_v9 = vpop.eup %844 }
0x114d   :  { %682 = vrot.lane.b32.xlu0 %v845_v9, %s911_s16 }
0x11bf   :  { %v683_v0 = vpop.permute.xlu0 %682 }
0x11c0   :  { %v685_v10 = vmul.f32 %v683_v0, %v668_v39 }
0x11c2   :  { %687 = vrot.lane.b32.xlu0 %v685_v10, %s912_s0  ;;  %v913_v10 = vmov 0.0  }
0x11ec   :  { %220 = vmax.xlane.f32.xlu0 %v219_v12  ;;  %v773_v12 = vsel %vm244_vm3, 1.0, %v913_v10  ;;  %vm514_vm3 = vcmp.eq.s32.totalorder %v968_v37, 3 }
0x1234   :  { %v688_v14 = vpop.permute.xlu0 %687 }
0x1235   :  { %784 = vmatmul.msk.f32.vlgmr.msra.gmra.mxu2 %vm71_vm0, %v688_v14 }
0x125f   :  { %v221_v19 = vpop.xlane.xlu0 %220 }
0x1260   :  { %v222_v20 = vsub.f32 %v994_v7, %v221_v19  ;;  %v97_v7 = vpop.xlane.xlu1 %96 }
0x1261   :  { %v1125_v22 = vsub.f32 %v950_v24, %v97_v7 }
0x1262   :  { %v223_v25 = vmul.f32 1.442695, %v222_v20 }
0x1263   :  { %v99_v40 = vmul.f32 1.442695, %v1125_v22 }
0x1264   :  { %846 = vpow2.f32 %v223_v25 }
0x1265   :  { %848 = vpow2.f32 %v592_v26  ;;  %v273_v26 = vperm.slane %v1000_v13, 0 }
0x1266   :  { %850 = vpow2.f32 %v99_v40 }
0x1267   :  { %852 = vpow2.f32 %v346_v41 }
0x1268   :  { %854 = vpow2.f32 %v469_v53 }
0x126a   :  { %v1116_v27 = vpop.eup %846 }
0x126b   :  { %v225_v30 = vsel %vm94_vm1, %v1116_v27, 0.0  ;;  %v1120_v31 = vpop.eup %848 }
0x126c   :  { %226 = vadd.xlane.f32.xlu0 %v225_v30  ;;  %v594_v32 = vsel %vm94_vm1, %v1120_v31, 0.0  ;;  %v851_v54 = vpop.eup %850 }
0x126d   :  { %v1142_v55 = vpop.eup %852 }
0x126e   :  { %v348_v35 = vsel %vm94_vm1, %v1142_v55, 0.0  ;;  %v1147_v56 = vpop.eup %854 }
0x126f   :  { %v471_v57 = vsel %vm94_vm1, %v1147_v56, 0.0 }
0x1274   :  { %595 = vadd.xlane.f32.xlu0 %v594_v32  ;;  %v770_v32 = vsel %vm120_vm4, 1.0, %v913_v10  ;;  %vm640_vm4 = vcmp.eq.s32.totalorder %v954_v28, 4 }
0x12b8   :  { %v708_v44 = vpop.f32.mrf.mxu2 }
0x12b9   :  { %v709_v47 = vadd.f32 %v708_v44, %v988_v4  ;;  %v101_v4 = vsel %vm94_vm1, %v851_v54, 0.0 }
0x12bb   :  { %v711_v24 = vsel %vm94_vm1, %v709_v47, -inf  ;;  %v726_v51 = vadd.f32 %v725_v46, %v709_v47 }
0x12bc   :  { %712 = vmax.xlane.f32.xlu2 %v711_v24 }
0x12bd   :  { %v727_v52 = vsel %vm94_vm1, %v726_v51, -inf }
0x12be   :  { %728 = vmax.xlane.f32.xlu1 %v727_v52 }
0x12c4   :  { %102 = vadd.xlane.f32.xlu2 %v101_v4 }
0x12c6   :  { %349 = vadd.xlane.f32.xlu1 %v348_v35 }
0x12cc   :  { %472 = vadd.xlane.f32.xlu2 %v471_v57 }
0x12df   :  { %v227_v59 = vpop.xlane.xlu0 %226 }
0x12e0   :  { %856 = vlog2.f32 %v227_v59 }
0x12e6   :  { %v857_v60 = vpop.eup %856 }
0x12e7   :  { %v231_v1 = vmul.f32 0.6931472, %v857_v60  ;;  %v596_v6 = vpop.xlane.xlu0 %595 }
0x12e9   :  { %v1156_v9 = vsub.f32 %v222_v20, %v231_v1  ;;  %v150_v20 = vperm.slane %v961_v33, 0 }
0x132f   :  { %v713_v63 = vpop.xlane.xlu2 %712 }
0x1330   :  { %v1151_v39 = vsub.f32 %v709_v47, %v713_v63  ;;  %v396_v63 = vperm.slane %v1030_v58, 0 }
0x1331   :  { %v729_v2 = vpop.xlane.xlu1 %728 }
0x1332   :  { %v715_v3 = vmul.f32 1.442695, %v1151_v39  ;;  %vm730_vm0 = vcmp.ge.f32.partialorder %v726_v51, %v729_v2 }
0x1333   :  { %v731_v5 = vsel %vm730_vm0, %v957_v29, 128.0  ;;  %v247_v29 = vmul.f32 %v773_v12, %v1156_v9  ;;  %vm395_vm0 = vmand %vm147_vm5, %vm394_vm13  ;;  %vm752_vm13 = vcmp.eq.s32.totalorder %v954_v28, 5 }
0x1334   :  { %858 = vpow2.f32 %v715_v3  ;;  %v732_v8 = vsel %vm94_vm1, %v731_v5, inf }
0x1335   :  { %733 = vmin.xlane.f32.xlu2 %v732_v8  ;;  %860 = vrcp.f32 %v227_v59  ;;  %v248_v18 = vsel %vm94_vm1, %v247_v29, 0.0 }
0x1336   :  { %862 = vlog2.f32 %v596_v6 }
0x1337   :  { %v103_v0 = vpop.xlane.xlu2 %102 }
0x1338   :  { %864 = vrcp.f32 %v103_v0 }
0x1339   :  { %866 = vlog2.f32 %v103_v0  ;;  %v350_v14 = vpop.xlane.xlu1 %349 }
0x133a   :  { %v1163_v15 = vpop.eup %858  ;;  %868 = vrcp.f32 %v350_v14 }
0x133b   :  { %870 = vlog2.f32 %v350_v14  ;;  %v717_v16 = vsel %vm94_vm1, %v1163_v15, 0.0  ;;  %v861_v17 = vpop.eup %860  ;;  %v642_v14 = vperm.slane %v1090_v34, 0 }
0x133c   :  { %872 = vrcp.f32 %v596_v6  ;;  %718 = vadd.xlane.f32.xlu1 %v717_v16  ;;  %v863_v11 = vpop.eup %862  ;;  %v229_v36 = vmul.f32 %v861_v17, %v1116_v27 }
0x133d   :  { %249 = vadd.xlane.f32.xlu2 %v248_v18  ;;  %v600_v42 = vmul.f32 0.6931472, %v863_v11 }
0x133e   :  { %v865_v19 = vpop.eup %864  ;;  %v269_v47 = vperm.slane %v229_v36, 0  ;;  %v252_v5 = vmul.f32 %v1156_v9, %v229_v36 }
0x133f   :  { %v867_v25 = vpop.eup %866  ;;  %v473_v30 = vpop.xlane.xlu2 %472  ;;  %v105_v7 = vmul.f32 %v865_v19, %v851_v54  ;;  %v601_v1 = vsub.f32 %v1113_v23, %v600_v42  ;;  %v519_v23 = vperm.slane %v1059_v45, 0  ;;  %v782_v45 = vsel %vm1188_vm9, 1.0, %v913_v10 }
0x1340   :  { %v869_v40 = vpop.eup %868  ;;  %v107_v38 = vmul.f32 0.6931472, %v867_v25  ;;  %874 = vrcp.f32 %v473_v30  ;;  %v253_v19 = vsel %vm94_vm1, %v252_v5, 0.0 }
0x1341   :  { %v871_v41 = vpop.eup %870  ;;  %876 = vlog2.f32 %v473_v30  ;;  %v145_v13 = vperm.slane %v105_v7, 0  ;;  %v352_v46 = vmul.f32 %v869_v40, %v1142_v55  ;;  %v616_v16 = vmul.f32 %v782_v45, %v601_v1 }
0x1342   :  { %v873_v61 = vpop.eup %872  ;;  %v354_v62 = vmul.f32 0.6931472, %v871_v41  ;;  %v108_v44 = vsub.f32 %v1125_v22, %v107_v38 }
0x1343   :  { %v146_v43 = vsel %vm144_vm7, %v145_v13, 0.0  ;;  %v598_v54 = vmul.f32 %v873_v61, %v1120_v31  ;;  %v392_v59 = vperm.slane %v352_v46, 0  ;;  %vm518_vm7 = vmand %vm147_vm5, %vm517_vm2 }
0x1344   :  { %v123_v24 = vmul.f32 %v770_v32, %v108_v44  ;;  %v128_v51 = vmul.f32 %v108_v44, %v105_v7  ;;  %v355_v52 = vsub.f32 %v1128_v21, %v354_v62  ;;  %v151_v53 = vsel %vm149_vm10, %v150_v20, %v146_v43  ;;  %vm753_vm2 = vmand %vm147_vm5, %vm752_vm13 }
0x1345   :  { %v270_v55 = vsel %vm268_vm12, %v269_v47, %v151_v53  ;;  %vm637_vm10 = vcmp.eq.s32.totalorder %v968_v37, 4  ;;  %v638_v29 = vperm.slane %v598_v54, 0  ;;  %vm490_vm12 = vcmp.eq.s32.totalorder %v954_v28, %v805_v49 }
0x1346   :  { %v875_v4 = vpop.eup %874  ;;  %v124_v35 = vsel %vm94_vm1, %v123_v24, 0.0  ;;  %v129_v21 = vsel %vm94_vm1, %v128_v51, 0.0  ;;  %v375_v57 = vmul.f32 %v355_v52, %v352_v46  ;;  %v274_v2 = vsel %vm1206_vm14, %v273_v26, %v270_v55 }
0x1347   :  { %v877_v60 = vpop.eup %876  ;;  %125 = vadd.xlane.f32.xlu1 %v124_v35  ;;  %130 = vadd.xlane.f32.xlu0 %v129_v21  ;;  %v475_v31 = vmul.f32 %v875_v4, %v1147_v56  ;;  %v393_v58 = vsel %vm391_vm15, %v392_v59, %v274_v2  ;;  %v776_v56 = vsel %vm1181_vm8, 1.0, %v913_v10  ;;  %vm641_vm8 = vmand %vm147_vm5, %vm640_vm4  ;;  %v617_v26 = vsel %vm94_vm1, %v616_v16, 0.0 }
0x1348   :  { %v376_v3 = vsel %vm94_vm1, %v375_v57, 0.0  ;;  %v477_v8 = vmul.f32 0.6931472, %v877_v60  ;;  %v370_v0 = vmul.f32 %v776_v56, %v355_v52  ;;  %v397_v12 = vsel %vm395_vm0, %v396_v63, %v393_v58 }
0x1349   :  { %377 = vadd.xlane.f32.xlu2 %v376_v3  ;;  %v515_v6 = vperm.slane %v475_v31, 0  ;;  %v779_v34 = vsel %vm490_vm12, 1.0, %v913_v10  ;;  %v621_v7 = vmul.f32 %v601_v1, %v598_v54  ;;  %vm749_vm15 = vcmp.eq.s32.totalorder %v968_v37, 5 }
0x134a   :  { %v371_v11 = vsel %vm94_vm1, %v370_v0, 0.0  ;;  %v478_v20 = vsub.f32 %v1137_v50, %v477_v8 }
0x134b   :  { %v516_v9 = vsel %vm514_vm3, %v515_v6, %v397_v12  ;;  %v622_v36 = vsel %vm94_vm1, %v621_v7, 0.0 }
0x134c   :  { %v520_v17 = vsel %vm518_vm7, %v519_v23, %v516_v9  ;;  %v498_v30 = vmul.f32 %v478_v20, %v475_v31  ;;  %v493_v32 = vmul.f32 %v779_v34, %v478_v20 }
0x134d   :  { %v639_v18 = vsel %vm637_vm10, %v638_v29, %v520_v17 }
0x134e   :  { %v643_v25 = vsel %vm641_vm8, %v642_v14, %v639_v18  ;;  %v499_v48 = vsel %vm94_vm1, %v498_v30, 0.0  ;;  %v494_v49 = vsel %vm94_vm1, %v493_v32, 0.0 }
0x134f   :  { %372 = vadd.xlane.f32.xlu1 %v371_v11  ;;  %254 = vadd.xlane.f32.xlu0 %v253_v19 }
0x1351   :  { %618 = vadd.xlane.f32.xlu2 %v617_v26 }
0x1357   :  { %500 = vadd.xlane.f32.xlu1 %v499_v48  ;;  %495 = vadd.xlane.f32.xlu0 %v494_v49 }
0x135f   :  { %623 = vadd.xlane.f32.xlu0 %v622_v36 }
0x13a8   :  { %v734_v50 = vpop.xlane.xlu2 %733 }
0x13a9   :  { %v812_v40 = vceil.f32 %v734_v50  ;;  %v813_v38 = vfloor.f32 %v734_v50  ;;  %vm811_vm9 = vcmp.lt.s32.totalorder %v734_v50, 0  ;;  %v754_v42 = vperm.slane %v734_v50, 0 }
0x13ab   :  { %v814_v41 = vsel %vm811_vm9, %v812_v40, %v813_v38 }
0x13ac   :  { %v815_v13 = vcvt.f32.s32 %v814_v41 }
0x13ae   :  { %vm736_vm14 = vcmp.eq.s32.totalorder %v954_v28, %v815_v13 }
0x13af   :  { %v719_v33 = vpop.xlane.xlu1 %718  ;;  %v785_v47 = vsel %vm736_vm14, 1.0, %v913_v10 }
0x13b0   :  { %878 = vrcp.f32 %v719_v33  ;;  %v250_v4 = vpop.xlane.xlu2 %249 }
0x13b1   :  { %880 = vlog2.f32 %v719_v33 }
0x13b6   :  { %v879_v27 = vpop.eup %878 }
0x13b7   :  { %v881_v61 = vpop.eup %880  ;;  %v721_v62 = vmul.f32 %v879_v27, %v1163_v15 }
0x13b8   :  { %v723_v44 = vmul.f32 0.6931472, %v881_v61 }
0x13b9   :  { %v750_v46 = vperm.slane %v721_v62, 0 }
0x13ba   :  { %v724_v43 = vsub.f32 %v1151_v39, %v723_v44  ;;  %v131_v54 = vpop.xlane.xlu0 %130  ;;  %v126_v55 = vpop.xlane.xlu1 %125 }
0x13bb   :  { %v751_v24 = vsel %vm749_vm15, %v750_v46, %v643_v25  ;;  %v132_v39 = vsub.f32 0.0, %v131_v54  ;;  %v251_v60 = vadd.f32 %v250_v4, %v126_v55 }
0x13bc   :  { %v739_v51 = vmul.f32 %v785_v47, %v724_v43  ;;  %v744_v52 = vmul.f32 %v724_v43, %v721_v62  ;;  %v755_v53 = vsel %vm753_vm2, %v754_v42, %v751_v24  ;;  %v378_v21 = vpop.xlane.xlu2 %377 }
0x13be   :  { %v740_v15 = vsel %vm94_vm1, %v739_v51, 0.0  ;;  %v745_v22 = vsel %vm94_vm1, %v744_v52, 0.0  ;;  %vm756_vm1 = vcmp.eq.s32.totalorder %v968_v37, 6 }
0x13bf   :  { %741 = vadd.xlane.f32.xlu1 %v740_v15  ;;  %746 = vadd.xlane.f32.xlu2 %v745_v22  ;;  %vm757_vm5 = vmand %vm756_vm1, %vm148_vm6 }
0x13c0   :  { %vm760_vm0 = vmand %vm756_vm1, %vm271_vm11 }
0x13c2   :  { %v255_v35 = vpop.xlane.xlu0 %254  ;;  %v373_v57 = vpop.xlane.xlu1 %372 }
0x13c3   :  { %v256_v10 = vsub.f32 %v132_v39, %v255_v35  ;;  %v374_v31 = vadd.f32 %v373_v57, %v251_v60 }
0x13c4   :  { %v619_v63 = vpop.xlane.xlu2 %618 }
0x13c5   :  { %v379_v2 = vsub.f32 %v256_v10, %v378_v21 }
0x13ca   :  { %v496_v59 = vpop.xlane.xlu0 %495  ;;  %v501_v1 = vpop.xlane.xlu1 %500 }
0x13cb   :  { %v497_v3 = vadd.f32 %v496_v59, %v374_v31  ;;  %v502_v23 = vsub.f32 %v379_v2, %v501_v1 }
0x13cd   :  { %v620_v5 = vadd.f32 %v619_v63, %v497_v3 }
0x13d2   :  { %v624_v58 = vpop.xlane.xlu0 %623 }
0x13d3   :  { %v625_v56 = vsub.f32 %v502_v23, %v624_v58 }
0x1432   :  { %v742_v6 = vpop.xlane.xlu1 %741  ;;  %v747_v8 = vpop.xlane.xlu2 %746 }
0x1433   :  { %v743_v0 = vadd.f32 %v742_v6, %v620_v5  ;;  %v748_v12 = vsub.f32 %v625_v56, %v747_v8 }
0x1435   :  { %v758_v45 = vperm.slane %v743_v0, 0  ;;  %v761_v29 = vperm.slane %v748_v12, 0 }
0x1437   :  { %v759_v9 = vsel %vm757_vm5, %v758_v45, %v755_v53 }
0x1438   :  { %v762_v14 = vsel %vm760_vm0, %v761_v29, %v759_v9 }
0x1439   :  { %763 = vst [vmem:[%s1278_s2] sm:$0xff] %v762_v14 }
0x143a   :  { %768 = vsyncpa [#allocation3], 1 }

</bundles_post_ra>
